<compile_context>
chip_gen: v6e
topology: v6e:2x2x1
jax: 0.10.0
libtpu: 0.0.40
codegen_flags: <defaults>
</compile_context>

<pallas_src>
import jax
import jax.numpy as jnp
from jax.experimental import pallas as pl
from jax.experimental.pallas import tpu as pltpu


# ---------------------------------------------------------------------------
# Recurrent Pallas kernel: one GRU layer, grid over time *chunks* (sequential).
# The fp32 hidden state lives in a VMEM scratch persisting across grid steps.
# ---------------------------------------------------------------------------
def _gru_recur_kernel(h0_ref, gi_ref, whh_ref, bhn_ref, out_ref, h_scr):
    @pl.when(pl.program_id(0) == 0)
    def _init():
        h_scr[...] = h0_ref[...]                       # fp32 initial hidden state

    t_chunk = gi_ref.shape[0]

    # Hidden->gate weights, loaded once per chunk (bf16, lane-aligned (D, D)).
    w_r = whh_ref[0]
    w_z = whh_ref[1]
    w_n = whh_ref[2]
    b_hn = bhn_ref[...]                                # (1, D) fp32

    def step(t, h_prev):
        gi = gi_ref[t]                                 # (3, B, D) fp32, biases folded in
        h_bf = h_prev.astype(jnp.bfloat16)
        gh_r = jnp.dot(h_bf, w_r, preferred_element_type=jnp.float32)
        gh_z = jnp.dot(h_bf, w_z, preferred_element_type=jnp.float32)
        gh_n = jnp.dot(h_bf, w_n, preferred_element_type=jnp.float32)

        r = jax.nn.sigmoid(gi[0] + gh_r)
        z = jax.nn.sigmoid(gi[1] + gh_z)
        n = jnp.tanh(gi[2] + r * (gh_n + b_hn))
        h_new = n + z * (h_prev - n)                   # == (1-z)*n + z*h_prev

        out_ref[t] = h_new.astype(out_ref.dtype)
        return h_new

    h_last = jax.lax.fori_loop(0, t_chunk, step, h_scr[...], unroll=True)
    h_scr[...] = h_last


def _pick_chunk(T):
    for c in (32, 16, 8, 4, 2, 1):
        if T % c == 0:
            return c
    return 1


def _gru_layer(x, h0, w_ih, w_hh, b_ih, b_hh, *, time_major):
    """One GRU layer.

    x:  (B, T, D_in) if not time_major else (T, B, D_in)
    h0: (B, D)
    returns the output sequence in time-major layout (T, B, D), fp32.
    """
    D = w_hh.shape[1]
    if time_major:
        T, B, D_in = x.shape
    else:
        B, T, D_in = x.shape

    # Gate-major weight layouts: (3, D, D_in) and transposed hidden (3, D, D).
    wih3 = w_ih.reshape(3, D, D_in).astype(jnp.bfloat16)
    whh3_t = jnp.transpose(w_hh.reshape(3, D, D), (0, 2, 1)).astype(jnp.bfloat16)

    bi3 = b_ih.reshape(3, D)
    bh3 = b_hh.reshape(3, D)
    # Fold b_ih fully and the r/z parts of b_hh into the hoisted projection;
    # only b_hn must stay inside the recurrence (it sits under the r* gate).
    bias_fold = bi3 + bh3.at[2].set(0.0)                      # (3, D)
    b_hn = bh3[2].reshape(1, D).astype(jnp.float32)

    # Hoisted input projection for ALL timesteps in one big bf16 MXU matmul,
    # produced directly in time-major, gate-major layout (T, 3, B, D), fp32.
    eq = "tbd,ked->tkbe" if time_major else "btd,ked->tkbe"
    gi = jnp.einsum(eq, x.astype(jnp.bfloat16), wih3,
                    preferred_element_type=jnp.float32)
    gi = gi + bias_fold[None, :, None, :]

    t_chunk = _pick_chunk(T)
    grid = (T // t_chunk,)

    # TODO(synk): for production batch sizes on v7x, add a leading "parallel"
    # batch grid axis to shard B across the two TensorCores (B=2 here is moot).
    return pl.pallas_call(
        _gru_recur_kernel,
        out_shape=jax.ShapeDtypeStruct((T, B, D), jnp.float32),
        grid_spec=pltpu.PrefetchScalarGridSpec(
            num_scalar_prefetch=0,
            grid=grid,
            in_specs=[
                pl.BlockSpec((B, D), lambda c: (0, 0)),               # h0
                pl.BlockSpec((t_chunk, 3, B, D), lambda c: (c, 0, 0, 0)),  # gi chunk
                pl.BlockSpec((3, D, D), lambda c: (0, 0, 0)),         # W_h{r,z,n}^T
                pl.BlockSpec((1, D), lambda c: (0, 0)),               # b_hn
            ],
            out_specs=pl.BlockSpec((t_chunk, B, D), lambda c: (c, 0, 0)),
            scratch_shapes=[pltpu.VMEM((B, D), jnp.float32)],
        ),
        compiler_params=pltpu.CompilerParams(
            dimension_semantics=("arbitrary",),        # recurrence: sequential
            vmem_limit_bytes=32 * 1024 * 1024,
        ),
    )(h0.astype(jnp.float32), gi, whh3_t, b_hn)


def decoder_forward(h, target_shifted, params):
    """Equivalent of Decoder.forward: returns `output` of nn.GRU.

    h:              (layers, B, n_dim)
    target_shifted: (B, T, n_dim)   (batch_first=True)
    params:         list of (w_ih, w_hh, b_ih, b_hh) per layer
    returns:        (B, T, n_dim)
    """
    x = target_shifted
    time_major = False
    for layer_idx, (w_ih, w_hh, b_ih, b_hh) in enumerate(params):
        x = _gru_layer(x, h[layer_idx], w_ih, w_hh, b_ih, b_hh,
                       time_major=time_major)
        time_major = True
        # dropout=0 in the module -> no inter-layer dropout
    return jnp.transpose(x, (1, 0, 2))                 # -> (B, T, D) batch_first


# ---------------------------------------------------------------------------
# Pure-JAX reference with the SAME bf16-matmul / fp32-accumulate numerics
# (matches the PyTorch GRU math up to bf16 matmul precision).
# ---------------------------------------------------------------------------
def _gru_reference(h, x_btd, params):
    x = jnp.transpose(x_btd, (1, 0, 2))  # (T, B, D)
    for layer_idx, (w_ih, w_hh, b_ih, b_hh) in enumerate(params):
        D = w_hh.shape[1]
        wih_t = jnp.transpose(w_ih).astype(jnp.bfloat16)
        whh_t = jnp.transpose(w_hh).astype(jnp.bfloat16)

        def step(h_prev, x_t):
            gi = jnp.dot(x_t.astype(jnp.bfloat16), wih_t,
                         preferred_element_type=jnp.float32) + b_ih
            gh = jnp.dot(h_prev.astype(jnp.bfloat16), whh_t,
                         preferred_element_type=jnp.float32) + b_hh
            r = jax.nn.sigmoid(gi[:, :D] + gh[:, :D])
            z = jax.nn.sigmoid(gi[:, D:2 * D] + gh[:, D:2 * D])
            n = jnp.tanh(gi[:, 2 * D:] + r * gh[:, 2 * D:])
            h_new = (1.0 - z) * n + z * h_prev
            return h_new, h_new

        _, x = jax.lax.scan(step, h[layer_idx], x)
    return jnp.transpose(x, (1, 0, 2))


def init_gru_params(key, n_dim, layers):
    """Deterministic init matching nn.GRU parameter shapes."""
    bound = 1.0 / jnp.sqrt(jnp.float32(n_dim))
    params = []
    for _ in range(layers):
        in_dim = n_dim  # input_size == hidden_size for every layer here
        key, k1, k2, k3, k4 = jax.random.split(key, 5)
        w_ih = jax.random.uniform(k1, (3 * n_dim, in_dim), jnp.float32, -bound, bound)
        w_hh = jax.random.uniform(k2, (3 * n_dim, n_dim), jnp.float32, -bound, bound)
        b_ih = jax.random.uniform(k3, (3 * n_dim,), jnp.float32, -bound, bound)
        b_hh = jax.random.uniform(k4, (3 * n_dim,), jnp.float32, -bound, bound)
        params.append((w_ih, w_hh, b_ih, b_hh))
    return params


if __name__ == "__main__":
    B, T, n_dim, layers = 2, 8, 32, 2

    key = jax.random.PRNGKey(0)
    key, kh, kx = jax.random.split(key, 3)
    params = init_gru_params(key, n_dim, layers)

    h0 = jax.random.normal(kh, (layers, B, n_dim), jnp.float32)
    target_shifted = jax.random.normal(kx, (B, T, n_dim), jnp.float32)

    out = decoder_forward(h0, target_shifted, params)
    out = jax.block_until_ready(out)

    ref = _gru_reference(h0, target_shifted, params)
    assert out.shape == (B, T, n_dim)
    assert jnp.allclose(out, ref, atol=1e-3, rtol=1e-3), "mismatch vs reference"

    print("KERNEL_OK")
</pallas_src>

<mosaic_0001>
module attributes {stable_mosaic.version = 11 : i64} {
  func.func @_gru_recur_kernel(%arg0: i32, %arg1: memref<2x32xf32, #tpu.memory_space<vmem>>, %arg2: memref<8x3x2x32xf32, #tpu.memory_space<vmem>>, %arg3: memref<3x32x32xbf16, #tpu.memory_space<vmem>>, %arg4: memref<1x32xf32, #tpu.memory_space<vmem>>, %arg5: memref<8x2x32xf32, #tpu.memory_space<vmem>>, %arg6: memref<2x32xf32, #tpu.memory_space<vmem>>) attributes {dimension_semantics = [#tpu.dimension_semantics<arbitrary>], iteration_bounds = array<i64: 1>, scalar_prefetch = 0 : i64, scratch_operands = 1 : i64, tpu.core_type = #tpu.core_type<tc>, window_params = [{pipeline_mode = #tpu.pipeline_mode<synchronous>, transform_indices = @transform_0, window_bounds = array<i64: 2, 32>}, {transform_indices = @transform_1, window_bounds = array<i64: 8, 3, 2, 32>}, {pipeline_mode = #tpu.pipeline_mode<synchronous>, transform_indices = @transform_2, window_bounds = array<i64: 3, 32, 32>}, {pipeline_mode = #tpu.pipeline_mode<synchronous>, transform_indices = @transform_3, window_bounds = array<i64: 1, 32>}, {transform_indices = @transform_4, window_bounds = array<i64: 8, 2, 32>}]} {
    %c0_i32 = arith.constant 0 : i32
    %0 = arith.cmpi eq, %arg0, %c0_i32 : i32
    %1 = arith.extui %0 : i1 to i32
    %c0_i32_0 = arith.constant 0 : i32
    %2 = arith.cmpi ne, %1, %c0_i32_0 : i32
    scf.if %2 {
      %c0_93 = arith.constant 0 : index
      %c0_94 = arith.constant 0 : index
      %308 = vector.load %arg1[%c0_93, %c0_94] : memref<2x32xf32, #tpu.memory_space<vmem>>, vector<2x32xf32>
      %c0_95 = arith.constant 0 : index
      %c0_96 = arith.constant 0 : index
      %309 = vector.load %arg6[%c0_95, %c0_96] : memref<2x32xf32, #tpu.memory_space<vmem>>, vector<2x32xf32>
      tpu.vector_store %arg6[%c0_95, %c0_96], %308 {strides = array<i32>} : memref<2x32xf32, #tpu.memory_space<vmem>>, vector<2x32xf32>,
    } else {
    }
    %c0 = arith.constant 0 : index
    %c0_1 = arith.constant 0 : index
    %c0_2 = arith.constant 0 : index
    %3 = vector.load %arg3[%c0, %c0_1, %c0_2] : memref<3x32x32xbf16, #tpu.memory_space<vmem>>, vector<1x32x32xbf16>
    %4 = vector.shape_cast %3 : vector<1x32x32xbf16> to vector<32x32xbf16>
    %c1 = arith.constant 1 : index
    %c0_3 = arith.constant 0 : index
    %c0_4 = arith.constant 0 : index
    %5 = vector.load %arg3[%c1, %c0_3, %c0_4] : memref<3x32x32xbf16, #tpu.memory_space<vmem>>, vector<1x32x32xbf16>
    %6 = vector.shape_cast %5 : vector<1x32x32xbf16> to vector<32x32xbf16>
    %c2 = arith.constant 2 : index
    %c0_5 = arith.constant 0 : index
    %c0_6 = arith.constant 0 : index
    %7 = vector.load %arg3[%c2, %c0_5, %c0_6] : memref<3x32x32xbf16, #tpu.memory_space<vmem>>, vector<1x32x32xbf16>
    %8 = vector.shape_cast %7 : vector<1x32x32xbf16> to vector<32x32xbf16>
    %c0_7 = arith.constant 0 : index
    %c0_8 = arith.constant 0 : index
    %9 = vector.load %arg4[%c0_7, %c0_8] : memref<1x32xf32, #tpu.memory_space<vmem>>, vector<1x32xf32>
    %c0_9 = arith.constant 0 : index
    %c0_10 = arith.constant 0 : index
    %10 = vector.load %arg6[%c0_9, %c0_10] : memref<2x32xf32, #tpu.memory_space<vmem>>, vector<2x32xf32>
    %c0_i32_11 = arith.constant 0 : i32
    %11 = arith.index_cast %c0_i32_11 : i32 to index
    %c0_12 = arith.constant 0 : index
    %c0_13 = arith.constant 0 : index
    %c0_14 = arith.constant 0 : index
    %12 = vector.load %arg2[%11, %c0_12, %c0_13, %c0_14] : memref<8x3x2x32xf32, #tpu.memory_space<vmem>>, vector<1x3x2x32xf32>
    %13 = vector.shape_cast %12 : vector<1x3x2x32xf32> to vector<3x2x32xf32>
    %14 = arith.truncf %10 : vector<2x32xf32> to vector<2x32xbf16>
    %cst = arith.constant dense<0.000000e+00> : vector<2x32xf32>
    %15 = tpu.matmul %14, %4, %cst {dimension_numbers = #tpu.dot_dimension_numbers<[1], [0], [0], [1], [0, 0, 1, 1], [], []>} : vector<2x32xbf16>, vector<32x32xbf16>, vector<2x32xf32> -> vector<2x32xf32>
    %cst_15 = arith.constant dense<0.000000e+00> : vector<2x32xf32>
    %16 = tpu.matmul %14, %6, %cst_15 {dimension_numbers = #tpu.dot_dimension_numbers<[1], [0], [0], [1], [0, 0, 1, 1], [], []>} : vector<2x32xbf16>, vector<32x32xbf16>, vector<2x32xf32> -> vector<2x32xf32>
    %cst_16 = arith.constant dense<0.000000e+00> : vector<2x32xf32>
    %17 = tpu.matmul %14, %8, %cst_16 {dimension_numbers = #tpu.dot_dimension_numbers<[1], [0], [0], [1], [0, 0, 1, 1], [], []>} : vector<2x32xbf16>, vector<32x32xbf16>, vector<2x32xf32> -> vector<2x32xf32>
    %18 = vector.extract_strided_slice %13 {offsets = [0, 0, 0], sizes = [1, 2, 32], strides = [1, 1, 1]} : vector<3x2x32xf32> to vector<1x2x32xf32>
    %19 = vector.shape_cast %18 : vector<1x2x32xf32> to vector<2x32xf32>
    %20 = arith.addf %19, %15 : vector<2x32xf32>
    %21 = arith.negf %20 : vector<2x32xf32>
    %22 = math.exp %21 : vector<2x32xf32>
    %cst_17 = arith.constant 1.000000e+00 : f32
    %23 = vector.broadcast %cst_17 : f32 to vector<2x32xf32>
    %24 = arith.addf %23, %22 : vector<2x32xf32>
    %25 = arith.divf %23, %24 : vector<2x32xf32>
    %26 = vector.extract_strided_slice %13 {offsets = [1, 0, 0], sizes = [1, 2, 32], strides = [1, 1, 1]} : vector<3x2x32xf32> to vector<1x2x32xf32>
    %27 = vector.shape_cast %26 : vector<1x2x32xf32> to vector<2x32xf32>
    %28 = arith.addf %27, %16 : vector<2x32xf32>
    %29 = arith.negf %28 : vector<2x32xf32>
    %30 = math.exp %29 : vector<2x32xf32>
    %cst_18 = arith.constant 1.000000e+00 : f32
    %31 = vector.broadcast %cst_18 : f32 to vector<2x32xf32>
    %32 = arith.addf %31, %30 : vector<2x32xf32>
    %33 = arith.divf %31, %32 : vector<2x32xf32>
    %34 = vector.extract_strided_slice %13 {offsets = [2, 0, 0], sizes = [1, 2, 32], strides = [1, 1, 1]} : vector<3x2x32xf32> to vector<1x2x32xf32>
    %35 = vector.shape_cast %34 : vector<1x2x32xf32> to vector<2x32xf32>
    %36 = vector.broadcast %9 : vector<1x32xf32> to vector<2x32xf32>
    %37 = arith.addf %17, %36 : vector<2x32xf32>
    %38 = arith.mulf %25, %37 : vector<2x32xf32>
    %39 = arith.addf %35, %38 : vector<2x32xf32>
    %40 = math.tanh %39 : vector<2x32xf32>
    %41 = arith.subf %10, %40 : vector<2x32xf32>
    %42 = arith.mulf %33, %41 : vector<2x32xf32>
    %43 = arith.addf %40, %42 : vector<2x32xf32>
    %44 = arith.index_cast %c0_i32_11 : i32 to index
    %c0_19 = arith.constant 0 : index
    %c0_20 = arith.constant 0 : index
    %45 = vector.load %arg5[%44, %c0_19, %c0_20] : memref<8x2x32xf32, #tpu.memory_space<vmem>>, vector<1x2x32xf32>
    %46 = vector.shape_cast %45 : vector<1x2x32xf32> to vector<2x32xf32>
    %47 = vector.shape_cast %43 : vector<2x32xf32> to vector<1x2x32xf32>
    tpu.vector_store %arg5[%44, %c0_19, %c0_20], %47 {strides = array<i32>} : memref<8x2x32xf32, #tpu.memory_space<vmem>>, vector<1x2x32xf32>,
    %c1_i32 = arith.constant 1 : i32
    %48 = arith.index_cast %c1_i32 : i32 to index
    %c0_21 = arith.constant 0 : index
    %c0_22 = arith.constant 0 : index
    %c0_23 = arith.constant 0 : index
    %49 = vector.load %arg2[%48, %c0_21, %c0_22, %c0_23] : memref<8x3x2x32xf32, #tpu.memory_space<vmem>>, vector<1x3x2x32xf32>
    %50 = vector.shape_cast %49 : vector<1x3x2x32xf32> to vector<3x2x32xf32>
    %51 = arith.truncf %43 : vector<2x32xf32> to vector<2x32xbf16>
    %cst_24 = arith.constant dense<0.000000e+00> : vector<2x32xf32>
    %52 = tpu.matmul %51, %4, %cst_24 {dimension_numbers = #tpu.dot_dimension_numbers<[1], [0], [0], [1], [0, 0, 1, 1], [], []>} : vector<2x32xbf16>, vector<32x32xbf16>, vector<2x32xf32> -> vector<2x32xf32>
    %cst_25 = arith.constant dense<0.000000e+00> : vector<2x32xf32>
    %53 = tpu.matmul %51, %6, %cst_25 {dimension_numbers = #tpu.dot_dimension_numbers<[1], [0], [0], [1], [0, 0, 1, 1], [], []>} : vector<2x32xbf16>, vector<32x32xbf16>, vector<2x32xf32> -> vector<2x32xf32>
    %cst_26 = arith.constant dense<0.000000e+00> : vector<2x32xf32>
    %54 = tpu.matmul %51, %8, %cst_26 {dimension_numbers = #tpu.dot_dimension_numbers<[1], [0], [0], [1], [0, 0, 1, 1], [], []>} : vector<2x32xbf16>, vector<32x32xbf16>, vector<2x32xf32> -> vector<2x32xf32>
    %55 = vector.extract_strided_slice %50 {offsets = [0, 0, 0], sizes = [1, 2, 32], strides = [1, 1, 1]} : vector<3x2x32xf32> to vector<1x2x32xf32>
    %56 = vector.shape_cast %55 : vector<1x2x32xf32> to vector<2x32xf32>
    %57 = arith.addf %56, %52 : vector<2x32xf32>
    %58 = arith.negf %57 : vector<2x32xf32>
    %59 = math.exp %58 : vector<2x32xf32>
    %cst_27 = arith.constant 1.000000e+00 : f32
    %60 = vector.broadcast %cst_27 : f32 to vector<2x32xf32>
    %61 = arith.addf %60, %59 : vector<2x32xf32>
    %62 = arith.divf %60, %61 : vector<2x32xf32>
    %63 = vector.extract_strided_slice %50 {offsets = [1, 0, 0], sizes = [1, 2, 32], strides = [1, 1, 1]} : vector<3x2x32xf32> to vector<1x2x32xf32>
    %64 = vector.shape_cast %63 : vector<1x2x32xf32> to vector<2x32xf32>
    %65 = arith.addf %64, %53 : vector<2x32xf32>
    %66 = arith.negf %65 : vector<2x32xf32>
    %67 = math.exp %66 : vector<2x32xf32>
    %cst_28 = arith.constant 1.000000e+00 : f32
    %68 = vector.broadcast %cst_28 : f32 to vector<2x32xf32>
    %69 = arith.addf %68, %67 : vector<2x32xf32>
    %70 = arith.divf %68, %69 : vector<2x32xf32>
    %71 = vector.extract_strided_slice %50 {offsets = [2, 0, 0], sizes = [1, 2, 32], strides = [1, 1, 1]} : vector<3x2x32xf32> to vector<1x2x32xf32>
    %72 = vector.shape_cast %71 : vector<1x2x32xf32> to vector<2x32xf32>
    %73 = vector.broadcast %9 : vector<1x32xf32> to vector<2x32xf32>
    %74 = arith.addf %54, %73 : vector<2x32xf32>
    %75 = arith.mulf %62, %74 : vector<2x32xf32>
    %76 = arith.addf %72, %75 : vector<2x32xf32>
    %77 = math.tanh %76 : vector<2x32xf32>
    %78 = arith.subf %43, %77 : vector<2x32xf32>
    %79 = arith.mulf %70, %78 : vector<2x32xf32>
    %80 = arith.addf %77, %79 : vector<2x32xf32>
    %81 = arith.index_cast %c1_i32 : i32 to index
    %c0_29 = arith.constant 0 : index
    %c0_30 = arith.constant 0 : index
    %82 = vector.load %arg5[%81, %c0_29, %c0_30] : memref<8x2x32xf32, #tpu.memory_space<vmem>>, vector<1x2x32xf32>
    %83 = vector.shape_cast %82 : vector<1x2x32xf32> to vector<2x32xf32>
    %84 = vector.shape_cast %80 : vector<2x32xf32> to vector<1x2x32xf32>
    tpu.vector_store %arg5[%81, %c0_29, %c0_30], %84 {strides = array<i32>} : memref<8x2x32xf32, #tpu.memory_space<vmem>>, vector<1x2x32xf32>,
    %c2_i32 = arith.constant 2 : i32
    %85 = arith.index_cast %c2_i32 : i32 to index
    %c0_31 = arith.constant 0 : index
    %c0_32 = arith.constant 0 : index
    %c0_33 = arith.constant 0 : index
    %86 = vector.load %arg2[%85, %c0_31, %c0_32, %c0_33] : memref<8x3x2x32xf32, #tpu.memory_space<vmem>>, vector<1x3x2x32xf32>
    %87 = vector.shape_cast %86 : vector<1x3x2x32xf32> to vector<3x2x32xf32>
    %88 = arith.truncf %80 : vector<2x32xf32> to vector<2x32xbf16>
    %cst_34 = arith.constant dense<0.000000e+00> : vector<2x32xf32>
    %89 = tpu.matmul %88, %4, %cst_34 {dimension_numbers = #tpu.dot_dimension_numbers<[1], [0], [0], [1], [0, 0, 1, 1], [], []>} : vector<2x32xbf16>, vector<32x32xbf16>, vector<2x32xf32> -> vector<2x32xf32>
    %cst_35 = arith.constant dense<0.000000e+00> : vector<2x32xf32>
    %90 = tpu.matmul %88, %6, %cst_35 {dimension_numbers = #tpu.dot_dimension_numbers<[1], [0], [0], [1], [0, 0, 1, 1], [], []>} : vector<2x32xbf16>, vector<32x32xbf16>, vector<2x32xf32> -> vector<2x32xf32>
    %cst_36 = arith.constant dense<0.000000e+00> : vector<2x32xf32>
    %91 = tpu.matmul %88, %8, %cst_36 {dimension_numbers = #tpu.dot_dimension_numbers<[1], [0], [0], [1], [0, 0, 1, 1], [], []>} : vector<2x32xbf16>, vector<32x32xbf16>, vector<2x32xf32> -> vector<2x32xf32>
    %92 = vector.extract_strided_slice %87 {offsets = [0, 0, 0], sizes = [1, 2, 32], strides = [1, 1, 1]} : vector<3x2x32xf32> to vector<1x2x32xf32>
    %93 = vector.shape_cast %92 : vector<1x2x32xf32> to vector<2x32xf32>
    %94 = arith.addf %93, %89 : vector<2x32xf32>
    %95 = arith.negf %94 : vector<2x32xf32>
    %96 = math.exp %95 : vector<2x32xf32>
    %cst_37 = arith.constant 1.000000e+00 : f32
    %97 = vector.broadcast %cst_37 : f32 to vector<2x32xf32>
    %98 = arith.addf %97, %96 : vector<2x32xf32>
    %99 = arith.divf %97, %98 : vector<2x32xf32>
    %100 = vector.extract_strided_slice %87 {offsets = [1, 0, 0], sizes = [1, 2, 32], strides = [1, 1, 1]} : vector<3x2x32xf32> to vector<1x2x32xf32>
    %101 = vector.shape_cast %100 : vector<1x2x32xf32> to vector<2x32xf32>
    %102 = arith.addf %101, %90 : vector<2x32xf32>
    %103 = arith.negf %102 : vector<2x32xf32>
    %104 = math.exp %103 : vector<2x32xf32>
    %cst_38 = arith.constant 1.000000e+00 : f32
    %105 = vector.broadcast %cst_38 : f32 to vector<2x32xf32>
    %106 = arith.addf %105, %104 : vector<2x32xf32>
    %107 = arith.divf %105, %106 : vector<2x32xf32>
    %108 = vector.extract_strided_slice %87 {offsets = [2, 0, 0], sizes = [1, 2, 32], strides = [1, 1, 1]} : vector<3x2x32xf32> to vector<1x2x32xf32>
    %109 = vector.shape_cast %108 : vector<1x2x32xf32> to vector<2x32xf32>
    %110 = vector.broadcast %9 : vector<1x32xf32> to vector<2x32xf32>
    %111 = arith.addf %91, %110 : vector<2x32xf32>
    %112 = arith.mulf %99, %111 : vector<2x32xf32>
    %113 = arith.addf %109, %112 : vector<2x32xf32>
    %114 = math.tanh %113 : vector<2x32xf32>
    %115 = arith.subf %80, %114 : vector<2x32xf32>
    %116 = arith.mulf %107, %115 : vector<2x32xf32>
    %117 = arith.addf %114, %116 : vector<2x32xf32>
    %118 = arith.index_cast %c2_i32 : i32 to index
    %c0_39 = arith.constant 0 : index
    %c0_40 = arith.constant 0 : index
    %119 = vector.load %arg5[%118, %c0_39, %c0_40] : memref<8x2x32xf32, #tpu.memory_space<vmem>>, vector<1x2x32xf32>
    %120 = vector.shape_cast %119 : vector<1x2x32xf32> to vector<2x32xf32>
    %121 = vector.shape_cast %117 : vector<2x32xf32> to vector<1x2x32xf32>
    tpu.vector_store %arg5[%118, %c0_39, %c0_40], %121 {strides = array<i32>} : memref<8x2x32xf32, #tpu.memory_space<vmem>>, vector<1x2x32xf32>,
    %c3_i32 = arith.constant 3 : i32
    %122 = arith.index_cast %c3_i32 : i32 to index
    %c0_41 = arith.constant 0 : index
    %c0_42 = arith.constant 0 : index
    %c0_43 = arith.constant 0 : index
    %123 = vector.load %arg2[%122, %c0_41, %c0_42, %c0_43] : memref<8x3x2x32xf32, #tpu.memory_space<vmem>>, vector<1x3x2x32xf32>
    %124 = vector.shape_cast %123 : vector<1x3x2x32xf32> to vector<3x2x32xf32>
    %125 = arith.truncf %117 : vector<2x32xf32> to vector<2x32xbf16>
    %cst_44 = arith.constant dense<0.000000e+00> : vector<2x32xf32>
    %126 = tpu.matmul %125, %4, %cst_44 {dimension_numbers = #tpu.dot_dimension_numbers<[1], [0], [0], [1], [0, 0, 1, 1], [], []>} : vector<2x32xbf16>, vector<32x32xbf16>, vector<2x32xf32> -> vector<2x32xf32>
    %cst_45 = arith.constant dense<0.000000e+00> : vector<2x32xf32>
    %127 = tpu.matmul %125, %6, %cst_45 {dimension_numbers = #tpu.dot_dimension_numbers<[1], [0], [0], [1], [0, 0, 1, 1], [], []>} : vector<2x32xbf16>, vector<32x32xbf16>, vector<2x32xf32> -> vector<2x32xf32>
    %cst_46 = arith.constant dense<0.000000e+00> : vector<2x32xf32>
    %128 = tpu.matmul %125, %8, %cst_46 {dimension_numbers = #tpu.dot_dimension_numbers<[1], [0], [0], [1], [0, 0, 1, 1], [], []>} : vector<2x32xbf16>, vector<32x32xbf16>, vector<2x32xf32> -> vector<2x32xf32>
    %129 = vector.extract_strided_slice %124 {offsets = [0, 0, 0], sizes = [1, 2, 32], strides = [1, 1, 1]} : vector<3x2x32xf32> to vector<1x2x32xf32>
    %130 = vector.shape_cast %129 : vector<1x2x32xf32> to vector<2x32xf32>
    %131 = arith.addf %130, %126 : vector<2x32xf32>
    %132 = arith.negf %131 : vector<2x32xf32>
    %133 = math.exp %132 : vector<2x32xf32>
    %cst_47 = arith.constant 1.000000e+00 : f32
    %134 = vector.broadcast %cst_47 : f32 to vector<2x32xf32>
    %135 = arith.addf %134, %133 : vector<2x32xf32>
    %136 = arith.divf %134, %135 : vector<2x32xf32>
    %137 = vector.extract_strided_slice %124 {offsets = [1, 0, 0], sizes = [1, 2, 32], strides = [1, 1, 1]} : vector<3x2x32xf32> to vector<1x2x32xf32>
    %138 = vector.shape_cast %137 : vector<1x2x32xf32> to vector<2x32xf32>
    %139 = arith.addf %138, %127 : vector<2x32xf32>
    %140 = arith.negf %139 : vector<2x32xf32>
    %141 = math.exp %140 : vector<2x32xf32>
    %cst_48 = arith.constant 1.000000e+00 : f32
    %142 = vector.broadcast %cst_48 : f32 to vector<2x32xf32>
    %143 = arith.addf %142, %141 : vector<2x32xf32>
    %144 = arith.divf %142, %143 : vector<2x32xf32>
    %145 = vector.extract_strided_slice %124 {offsets = [2, 0, 0], sizes = [1, 2, 32], strides = [1, 1, 1]} : vector<3x2x32xf32> to vector<1x2x32xf32>
    %146 = vector.shape_cast %145 : vector<1x2x32xf32> to vector<2x32xf32>
    %147 = vector.broadcast %9 : vector<1x32xf32> to vector<2x32xf32>
    %148 = arith.addf %128, %147 : vector<2x32xf32>
    %149 = arith.mulf %136, %148 : vector<2x32xf32>
    %150 = arith.addf %146, %149 : vector<2x32xf32>
    %151 = math.tanh %150 : vector<2x32xf32>
    %152 = arith.subf %117, %151 : vector<2x32xf32>
    %153 = arith.mulf %144, %152 : vector<2x32xf32>
    %154 = arith.addf %151, %153 : vector<2x32xf32>
    %155 = arith.index_cast %c3_i32 : i32 to index
    %c0_49 = arith.constant 0 : index
    %c0_50 = arith.constant 0 : index
    %156 = vector.load %arg5[%155, %c0_49, %c0_50] : memref<8x2x32xf32, #tpu.memory_space<vmem>>, vector<1x2x32xf32>
    %157 = vector.shape_cast %156 : vector<1x2x32xf32> to vector<2x32xf32>
    %158 = vector.shape_cast %154 : vector<2x32xf32> to vector<1x2x32xf32>
    tpu.vector_store %arg5[%155, %c0_49, %c0_50], %158 {strides = array<i32>} : memref<8x2x32xf32, #tpu.memory_space<vmem>>, vector<1x2x32xf32>,
    %c4_i32 = arith.constant 4 : i32
    %159 = arith.index_cast %c4_i32 : i32 to index
    %c0_51 = arith.constant 0 : index
    %c0_52 = arith.constant 0 : index
    %c0_53 = arith.constant 0 : index
    %160 = vector.load %arg2[%159, %c0_51, %c0_52, %c0_53] : memref<8x3x2x32xf32, #tpu.memory_space<vmem>>, vector<1x3x2x32xf32>
    %161 = vector.shape_cast %160 : vector<1x3x2x32xf32> to vector<3x2x32xf32>
    %162 = arith.truncf %154 : vector<2x32xf32> to vector<2x32xbf16>
    %cst_54 = arith.constant dense<0.000000e+00> : vector<2x32xf32>
    %163 = tpu.matmul %162, %4, %cst_54 {dimension_numbers = #tpu.dot_dimension_numbers<[1], [0], [0], [1], [0, 0, 1, 1], [], []>} : vector<2x32xbf16>, vector<32x32xbf16>, vector<2x32xf32> -> vector<2x32xf32>
    %cst_55 = arith.constant dense<0.000000e+00> : vector<2x32xf32>
    %164 = tpu.matmul %162, %6, %cst_55 {dimension_numbers = #tpu.dot_dimension_numbers<[1], [0], [0], [1], [0, 0, 1, 1], [], []>} : vector<2x32xbf16>, vector<32x32xbf16>, vector<2x32xf32> -> vector<2x32xf32>
    %cst_56 = arith.constant dense<0.000000e+00> : vector<2x32xf32>
    %165 = tpu.matmul %162, %8, %cst_56 {dimension_numbers = #tpu.dot_dimension_numbers<[1], [0], [0], [1], [0, 0, 1, 1], [], []>} : vector<2x32xbf16>, vector<32x32xbf16>, vector<2x32xf32> -> vector<2x32xf32>
    %166 = vector.extract_strided_slice %161 {offsets = [0, 0, 0], sizes = [1, 2, 32], strides = [1, 1, 1]} : vector<3x2x32xf32> to vector<1x2x32xf32>
    %167 = vector.shape_cast %166 : vector<1x2x32xf32> to vector<2x32xf32>
    %168 = arith.addf %167, %163 : vector<2x32xf32>
    %169 = arith.negf %168 : vector<2x32xf32>
    %170 = math.exp %169 : vector<2x32xf32>
    %cst_57 = arith.constant 1.000000e+00 : f32
    %171 = vector.broadcast %cst_57 : f32 to vector<2x32xf32>
    %172 = arith.addf %171, %170 : vector<2x32xf32>
    %173 = arith.divf %171, %172 : vector<2x32xf32>
    %174 = vector.extract_strided_slice %161 {offsets = [1, 0, 0], sizes = [1, 2, 32], strides = [1, 1, 1]} : vector<3x2x32xf32> to vector<1x2x32xf32>
    %175 = vector.shape_cast %174 : vector<1x2x32xf32> to vector<2x32xf32>
    %176 = arith.addf %175, %164 : vector<2x32xf32>
    %177 = arith.negf %176 : vector<2x32xf32>
    %178 = math.exp %177 : vector<2x32xf32>
    %cst_58 = arith.constant 1.000000e+00 : f32
    %179 = vector.broadcast %cst_58 : f32 to vector<2x32xf32>
    %180 = arith.addf %179, %178 : vector<2x32xf32>
    %181 = arith.divf %179, %180 : vector<2x32xf32>
    %182 = vector.extract_strided_slice %161 {offsets = [2, 0, 0], sizes = [1, 2, 32], strides = [1, 1, 1]} : vector<3x2x32xf32> to vector<1x2x32xf32>
    %183 = vector.shape_cast %182 : vector<1x2x32xf32> to vector<2x32xf32>
    %184 = vector.broadcast %9 : vector<1x32xf32> to vector<2x32xf32>
    %185 = arith.addf %165, %184 : vector<2x32xf32>
    %186 = arith.mulf %173, %185 : vector<2x32xf32>
    %187 = arith.addf %183, %186 : vector<2x32xf32>
    %188 = math.tanh %187 : vector<2x32xf32>
    %189 = arith.subf %154, %188 : vector<2x32xf32>
    %190 = arith.mulf %181, %189 : vector<2x32xf32>
    %191 = arith.addf %188, %190 : vector<2x32xf32>
    %192 = arith.index_cast %c4_i32 : i32 to index
    %c0_59 = arith.constant 0 : index
    %c0_60 = arith.constant 0 : index
    %193 = vector.load %arg5[%192, %c0_59, %c0_60] : memref<8x2x32xf32, #tpu.memory_space<vmem>>, vector<1x2x32xf32>
    %194 = vector.shape_cast %193 : vector<1x2x32xf32> to vector<2x32xf32>
    %195 = vector.shape_cast %191 : vector<2x32xf32> to vector<1x2x32xf32>
    tpu.vector_store %arg5[%192, %c0_59, %c0_60], %195 {strides = array<i32>} : memref<8x2x32xf32, #tpu.memory_space<vmem>>, vector<1x2x32xf32>,
    %c5_i32 = arith.constant 5 : i32
    %196 = arith.index_cast %c5_i32 : i32 to index
    %c0_61 = arith.constant 0 : index
    %c0_62 = arith.constant 0 : index
    %c0_63 = arith.constant 0 : index
    %197 = vector.load %arg2[%196, %c0_61, %c0_62, %c0_63] : memref<8x3x2x32xf32, #tpu.memory_space<vmem>>, vector<1x3x2x32xf32>
    %198 = vector.shape_cast %197 : vector<1x3x2x32xf32> to vector<3x2x32xf32>
    %199 = arith.truncf %191 : vector<2x32xf32> to vector<2x32xbf16>
    %cst_64 = arith.constant dense<0.000000e+00> : vector<2x32xf32>
    %200 = tpu.matmul %199, %4, %cst_64 {dimension_numbers = #tpu.dot_dimension_numbers<[1], [0], [0], [1], [0, 0, 1, 1], [], []>} : vector<2x32xbf16>, vector<32x32xbf16>, vector<2x32xf32> -> vector<2x32xf32>
    %cst_65 = arith.constant dense<0.000000e+00> : vector<2x32xf32>
    %201 = tpu.matmul %199, %6, %cst_65 {dimension_numbers = #tpu.dot_dimension_numbers<[1], [0], [0], [1], [0, 0, 1, 1], [], []>} : vector<2x32xbf16>, vector<32x32xbf16>, vector<2x32xf32> -> vector<2x32xf32>
    %cst_66 = arith.constant dense<0.000000e+00> : vector<2x32xf32>
    %202 = tpu.matmul %199, %8, %cst_66 {dimension_numbers = #tpu.dot_dimension_numbers<[1], [0], [0], [1], [0, 0, 1, 1], [], []>} : vector<2x32xbf16>, vector<32x32xbf16>, vector<2x32xf32> -> vector<2x32xf32>
    %203 = vector.extract_strided_slice %198 {offsets = [0, 0, 0], sizes = [1, 2, 32], strides = [1, 1, 1]} : vector<3x2x32xf32> to vector<1x2x32xf32>
    %204 = vector.shape_cast %203 : vector<1x2x32xf32> to vector<2x32xf32>
    %205 = arith.addf %204, %200 : vector<2x32xf32>
    %206 = arith.negf %205 : vector<2x32xf32>
    %207 = math.exp %206 : vector<2x32xf32>
    %cst_67 = arith.constant 1.000000e+00 : f32
    %208 = vector.broadcast %cst_67 : f32 to vector<2x32xf32>
    %209 = arith.addf %208, %207 : vector<2x32xf32>
    %210 = arith.divf %208, %209 : vector<2x32xf32>
    %211 = vector.extract_strided_slice %198 {offsets = [1, 0, 0], sizes = [1, 2, 32], strides = [1, 1, 1]} : vector<3x2x32xf32> to vector<1x2x32xf32>
    %212 = vector.shape_cast %211 : vector<1x2x32xf32> to vector<2x32xf32>
    %213 = arith.addf %212, %201 : vector<2x32xf32>
    %214 = arith.negf %213 : vector<2x32xf32>
    %215 = math.exp %214 : vector<2x32xf32>
    %cst_68 = arith.constant 1.000000e+00 : f32
    %216 = vector.broadcast %cst_68 : f32 to vector<2x32xf32>
    %217 = arith.addf %216, %215 : vector<2x32xf32>
    %218 = arith.divf %216, %217 : vector<2x32xf32>
    %219 = vector.extract_strided_slice %198 {offsets = [2, 0, 0], sizes = [1, 2, 32], strides = [1, 1, 1]} : vector<3x2x32xf32> to vector<1x2x32xf32>
    %220 = vector.shape_cast %219 : vector<1x2x32xf32> to vector<2x32xf32>
    %221 = vector.broadcast %9 : vector<1x32xf32> to vector<2x32xf32>
    %222 = arith.addf %202, %221 : vector<2x32xf32>
    %223 = arith.mulf %210, %222 : vector<2x32xf32>
    %224 = arith.addf %220, %223 : vector<2x32xf32>
    %225 = math.tanh %224 : vector<2x32xf32>
    %226 = arith.subf %191, %225 : vector<2x32xf32>
    %227 = arith.mulf %218, %226 : vector<2x32xf32>
    %228 = arith.addf %225, %227 : vector<2x32xf32>
    %229 = arith.index_cast %c5_i32 : i32 to index
    %c0_69 = arith.constant 0 : index
    %c0_70 = arith.constant 0 : index
    %230 = vector.load %arg5[%229, %c0_69, %c0_70] : memref<8x2x32xf32, #tpu.memory_space<vmem>>, vector<1x2x32xf32>
    %231 = vector.shape_cast %230 : vector<1x2x32xf32> to vector<2x32xf32>
    %232 = vector.shape_cast %228 : vector<2x32xf32> to vector<1x2x32xf32>
    tpu.vector_store %arg5[%229, %c0_69, %c0_70], %232 {strides = array<i32>} : memref<8x2x32xf32, #tpu.memory_space<vmem>>, vector<1x2x32xf32>,
    %c6_i32 = arith.constant 6 : i32
    %233 = arith.index_cast %c6_i32 : i32 to index
    %c0_71 = arith.constant 0 : index
    %c0_72 = arith.constant 0 : index
    %c0_73 = arith.constant 0 : index
    %234 = vector.load %arg2[%233, %c0_71, %c0_72, %c0_73] : memref<8x3x2x32xf32, #tpu.memory_space<vmem>>, vector<1x3x2x32xf32>
    %235 = vector.shape_cast %234 : vector<1x3x2x32xf32> to vector<3x2x32xf32>
    %236 = arith.truncf %228 : vector<2x32xf32> to vector<2x32xbf16>
    %cst_74 = arith.constant dense<0.000000e+00> : vector<2x32xf32>
    %237 = tpu.matmul %236, %4, %cst_74 {dimension_numbers = #tpu.dot_dimension_numbers<[1], [0], [0], [1], [0, 0, 1, 1], [], []>} : vector<2x32xbf16>, vector<32x32xbf16>, vector<2x32xf32> -> vector<2x32xf32>
    %cst_75 = arith.constant dense<0.000000e+00> : vector<2x32xf32>
    %238 = tpu.matmul %236, %6, %cst_75 {dimension_numbers = #tpu.dot_dimension_numbers<[1], [0], [0], [1], [0, 0, 1, 1], [], []>} : vector<2x32xbf16>, vector<32x32xbf16>, vector<2x32xf32> -> vector<2x32xf32>
    %cst_76 = arith.constant dense<0.000000e+00> : vector<2x32xf32>
    %239 = tpu.matmul %236, %8, %cst_76 {dimension_numbers = #tpu.dot_dimension_numbers<[1], [0], [0], [1], [0, 0, 1, 1], [], []>} : vector<2x32xbf16>, vector<32x32xbf16>, vector<2x32xf32> -> vector<2x32xf32>
    %240 = vector.extract_strided_slice %235 {offsets = [0, 0, 0], sizes = [1, 2, 32], strides = [1, 1, 1]} : vector<3x2x32xf32> to vector<1x2x32xf32>
    %241 = vector.shape_cast %240 : vector<1x2x32xf32> to vector<2x32xf32>
    %242 = arith.addf %241, %237 : vector<2x32xf32>
    %243 = arith.negf %242 : vector<2x32xf32>
    %244 = math.exp %243 : vector<2x32xf32>
    %cst_77 = arith.constant 1.000000e+00 : f32
    %245 = vector.broadcast %cst_77 : f32 to vector<2x32xf32>
    %246 = arith.addf %245, %244 : vector<2x32xf32>
    %247 = arith.divf %245, %246 : vector<2x32xf32>
    %248 = vector.extract_strided_slice %235 {offsets = [1, 0, 0], sizes = [1, 2, 32], strides = [1, 1, 1]} : vector<3x2x32xf32> to vector<1x2x32xf32>
    %249 = vector.shape_cast %248 : vector<1x2x32xf32> to vector<2x32xf32>
    %250 = arith.addf %249, %238 : vector<2x32xf32>
    %251 = arith.negf %250 : vector<2x32xf32>
    %252 = math.exp %251 : vector<2x32xf32>
    %cst_78 = arith.constant 1.000000e+00 : f32
    %253 = vector.broadcast %cst_78 : f32 to vector<2x32xf32>
    %254 = arith.addf %253, %252 : vector<2x32xf32>
    %255 = arith.divf %253, %254 : vector<2x32xf32>
    %256 = vector.extract_strided_slice %235 {offsets = [2, 0, 0], sizes = [1, 2, 32], strides = [1, 1, 1]} : vector<3x2x32xf32> to vector<1x2x32xf32>
    %257 = vector.shape_cast %256 : vector<1x2x32xf32> to vector<2x32xf32>
    %258 = vector.broadcast %9 : vector<1x32xf32> to vector<2x32xf32>
    %259 = arith.addf %239, %258 : vector<2x32xf32>
    %260 = arith.mulf %247, %259 : vector<2x32xf32>
    %261 = arith.addf %257, %260 : vector<2x32xf32>
    %262 = math.tanh %261 : vector<2x32xf32>
    %263 = arith.subf %228, %262 : vector<2x32xf32>
    %264 = arith.mulf %255, %263 : vector<2x32xf32>
    %265 = arith.addf %262, %264 : vector<2x32xf32>
    %266 = arith.index_cast %c6_i32 : i32 to index
    %c0_79 = arith.constant 0 : index
    %c0_80 = arith.constant 0 : index
    %267 = vector.load %arg5[%266, %c0_79, %c0_80] : memref<8x2x32xf32, #tpu.memory_space<vmem>>, vector<1x2x32xf32>
    %268 = vector.shape_cast %267 : vector<1x2x32xf32> to vector<2x32xf32>
    %269 = vector.shape_cast %265 : vector<2x32xf32> to vector<1x2x32xf32>
    tpu.vector_store %arg5[%266, %c0_79, %c0_80], %269 {strides = array<i32>} : memref<8x2x32xf32, #tpu.memory_space<vmem>>, vector<1x2x32xf32>,
    %c7_i32 = arith.constant 7 : i32
    %270 = arith.index_cast %c7_i32 : i32 to index
    %c0_81 = arith.constant 0 : index
    %c0_82 = arith.constant 0 : index
    %c0_83 = arith.constant 0 : index
    %271 = vector.load %arg2[%270, %c0_81, %c0_82, %c0_83] : memref<8x3x2x32xf32, #tpu.memory_space<vmem>>, vector<1x3x2x32xf32>
    %272 = vector.shape_cast %271 : vector<1x3x2x32xf32> to vector<3x2x32xf32>
    %273 = arith.truncf %265 : vector<2x32xf32> to vector<2x32xbf16>
    %cst_84 = arith.constant dense<0.000000e+00> : vector<2x32xf32>
    %274 = tpu.matmul %273, %4, %cst_84 {dimension_numbers = #tpu.dot_dimension_numbers<[1], [0], [0], [1], [0, 0, 1, 1], [], []>} : vector<2x32xbf16>, vector<32x32xbf16>, vector<2x32xf32> -> vector<2x32xf32>
    %cst_85 = arith.constant dense<0.000000e+00> : vector<2x32xf32>
    %275 = tpu.matmul %273, %6, %cst_85 {dimension_numbers = #tpu.dot_dimension_numbers<[1], [0], [0], [1], [0, 0, 1, 1], [], []>} : vector<2x32xbf16>, vector<32x32xbf16>, vector<2x32xf32> -> vector<2x32xf32>
    %cst_86 = arith.constant dense<0.000000e+00> : vector<2x32xf32>
    %276 = tpu.matmul %273, %8, %cst_86 {dimension_numbers = #tpu.dot_dimension_numbers<[1], [0], [0], [1], [0, 0, 1, 1], [], []>} : vector<2x32xbf16>, vector<32x32xbf16>, vector<2x32xf32> -> vector<2x32xf32>
    %277 = vector.extract_strided_slice %272 {offsets = [0, 0, 0], sizes = [1, 2, 32], strides = [1, 1, 1]} : vector<3x2x32xf32> to vector<1x2x32xf32>
    %278 = vector.shape_cast %277 : vector<1x2x32xf32> to vector<2x32xf32>
    %279 = arith.addf %278, %274 : vector<2x32xf32>
    %280 = arith.negf %279 : vector<2x32xf32>
    %281 = math.exp %280 : vector<2x32xf32>
    %cst_87 = arith.constant 1.000000e+00 : f32
    %282 = vector.broadcast %cst_87 : f32 to vector<2x32xf32>
    %283 = arith.addf %282, %281 : vector<2x32xf32>
    %284 = arith.divf %282, %283 : vector<2x32xf32>
    %285 = vector.extract_strided_slice %272 {offsets = [1, 0, 0], sizes = [1, 2, 32], strides = [1, 1, 1]} : vector<3x2x32xf32> to vector<1x2x32xf32>
    %286 = vector.shape_cast %285 : vector<1x2x32xf32> to vector<2x32xf32>
    %287 = arith.addf %286, %275 : vector<2x32xf32>
    %288 = arith.negf %287 : vector<2x32xf32>
    %289 = math.exp %288 : vector<2x32xf32>
    %cst_88 = arith.constant 1.000000e+00 : f32
    %290 = vector.broadcast %cst_88 : f32 to vector<2x32xf32>
    %291 = arith.addf %290, %289 : vector<2x32xf32>
    %292 = arith.divf %290, %291 : vector<2x32xf32>
    %293 = vector.extract_strided_slice %272 {offsets = [2, 0, 0], sizes = [1, 2, 32], strides = [1, 1, 1]} : vector<3x2x32xf32> to vector<1x2x32xf32>
    %294 = vector.shape_cast %293 : vector<1x2x32xf32> to vector<2x32xf32>
    %295 = vector.broadcast %9 : vector<1x32xf32> to vector<2x32xf32>
    %296 = arith.addf %276, %295 : vector<2x32xf32>
    %297 = arith.mulf %284, %296 : vector<2x32xf32>
    %298 = arith.addf %294, %297 : vector<2x32xf32>
    %299 = math.tanh %298 : vector<2x32xf32>
    %300 = arith.subf %265, %299 : vector<2x32xf32>
    %301 = arith.mulf %292, %300 : vector<2x32xf32>
    %302 = arith.addf %299, %301 : vector<2x32xf32>
    %303 = arith.index_cast %c7_i32 : i32 to index
    %c0_89 = arith.constant 0 : index
    %c0_90 = arith.constant 0 : index
    %304 = vector.load %arg5[%303, %c0_89, %c0_90] : memref<8x2x32xf32, #tpu.memory_space<vmem>>, vector<1x2x32xf32>
    %305 = vector.shape_cast %304 : vector<1x2x32xf32> to vector<2x32xf32>
    %306 = vector.shape_cast %302 : vector<2x32xf32> to vector<1x2x32xf32>
    tpu.vector_store %arg5[%303, %c0_89, %c0_90], %306 {strides = array<i32>} : memref<8x2x32xf32, #tpu.memory_space<vmem>>, vector<1x2x32xf32>,
    %c8_i32 = arith.constant 8 : i32
    %c0_91 = arith.constant 0 : index
    %c0_92 = arith.constant 0 : index
    %307 = vector.load %arg6[%c0_91, %c0_92] : memref<2x32xf32, #tpu.memory_space<vmem>>, vector<2x32xf32>
    tpu.vector_store %arg6[%c0_91, %c0_92], %302 {strides = array<i32>} : memref<2x32xf32, #tpu.memory_space<vmem>>, vector<2x32xf32>,
    return
  }
  func.func @transform_0(%arg0: i32) -> (i32, i32) {
    %c0_i32 = arith.constant 0 : i32
    %c0_i32_0 = arith.constant 0 : i32
    %c0_i32_1 = arith.constant 0 : i32
    return %c0_i32, %c0_i32_0 : i32, i32
  }
  func.func @transform_1(%arg0: i32) -> (i32, i32, i32, i32) {
    %c0_i32 = arith.constant 0 : i32
    %c0_i32_0 = arith.constant 0 : i32
    %c0_i32_1 = arith.constant 0 : i32
    %c0_i32_2 = arith.constant 0 : i32
    return %arg0, %c0_i32, %c0_i32_0, %c0_i32_1 : i32, i32, i32, i32
  }
  func.func @transform_2(%arg0: i32) -> (i32, i32, i32) {
    %c0_i32 = arith.constant 0 : i32
    %c0_i32_0 = arith.constant 0 : i32
    %c0_i32_1 = arith.constant 0 : i32
    %c0_i32_2 = arith.constant 0 : i32
    return %c0_i32, %c0_i32_0, %c0_i32_1 : i32, i32, i32
  }
  func.func @transform_3(%arg0: i32) -> (i32, i32) {
    %c0_i32 = arith.constant 0 : i32
    %c0_i32_0 = arith.constant 0 : i32
    %c0_i32_1 = arith.constant 0 : i32
    return %c0_i32, %c0_i32_0 : i32, i32
  }
  func.func @transform_4(%arg0: i32) -> (i32, i32, i32) {
    %c0_i32 = arith.constant 0 : i32
    %c0_i32_0 = arith.constant 0 : i32
    %c0_i32_1 = arith.constant 0 : i32
    return %arg0, %c0_i32, %c0_i32_0 : i32, i32, i32
  }
}

</mosaic_0001>

<bundles_post_ra>
// kernel: tpu_custom_call.1
= control target key start
LH: loop header
LB: loop body
LE: loop exit
PB: predicated region body
PF: predicated region fallthrough
CT: control target
= control target key end

     0   :  { %9 = vsyncpa [#allocation4], 0  ;;  %s2091_s0 = inlined_call_operand.hbm [shape: f32[2,32], index: 0, kind: input, shape index: {}]   ;;  %s2092_s1 = inlined_call_operand.hbm [shape: f32[8,3,2,32], index: 1, kind: input, shape index: {}]   ;;  %s2093_s2 = inlined_call_operand.hbm [shape: bf16[3,32,32], index: 2, kind: input, shape index: {}]   ;;  %s2094_s3 = inlined_call_operand.vmem [shape: f32[1,32], index: 3, kind: input, shape index: {}]   ;;  %s2095_s4 = inlined_call_operand.hbm [shape: f32[8,2,32], index: 4, kind: output, shape index: {}]  }
   0x1   :  { %10 = vsyncpa [#allocation7], 0 }
   0x2   :  { %11 = vsyncpa [#allocation5], 0  ;;  %s1835_s15 = smov [#allocation6]  }
   0x3   :  { %s27_s16 = sshll.u32 %s1835_s15, 4  ;;  %s28_s16 = int_to_ptr.vmem [resolvable:$true] %s27_s16 }
   0x4   :  { %s1757_s17 = scalar_lea.vmem %s28_s16, 768  ;;  %p1762_p1 = scmp.lt.s32.totalorder %s28_s16, %s28_s16 }
   0x5   :  { %p1758_p0 = scmp.ne.s32.totalorder %s28_s16, %s1757_s17  ;;  %p1763_p2 = scmp.lt.s32.totalorder %s1757_s17, %s1757_s17 }
   0x7   :  { %p1764_p3 = por %p1763_p2, %p1762_p1 }
   0x9   :  { %p1765_p4 = pnand %p1764_p3, %p1758_p0 }
   0xb   :  { %1768 = shalt.err (!%p1765_p4)
}
   0xc   :  { %s1836_s18 = smov 32   ;;  %s1837_s19 = smov 2  }
   0xd   :  { %33 = dma.hbm_to_vmem [thread:$0]  %s2092_s1, 768, %s28_s16, [#allocation7], %s1836_s18, %s1836_s18, %s1837_s19  }
   0xe   :  { %s1838_s22 = smov [#allocation3]   ;;  %s1839_s24 = smov [#allocation8]  }
   0xf   :  { %s18_s23 = sshll.u32 %s1838_s22, 4  ;;  %s39_s25 = sshll.u32 %s1839_s24, 4  ;;  %s19_s23 = int_to_ptr.vmem [resolvable:$true] %s18_s23  ;;  %s40_s25 = int_to_ptr.vmem [resolvable:$true] %s39_s25 }
  0x10   :  { %s1777_s26 = scalar_lea.vmem %s19_s23, 32  ;;  %p1782_p6 = scmp.lt.s32.totalorder %s19_s23, %s19_s23 }
  0x11   :  { %p1778_p5 = scmp.ne.s32.totalorder %s19_s23, %s1777_s26  ;;  %p1783_p7 = scmp.lt.s32.totalorder %s1777_s26, %s1777_s26 }
  0x13   :  { %p1784_p8 = por %p1783_p7, %p1782_p6 }
  0x15   :  { %p1785_p9 = pnand %p1784_p8, %p1778_p5 }
  0x17   :  { %1788 = shalt.err (!%p1785_p9)
}
  0x18   :  { %21 = dma.hbm_to_vmem [thread:$0]  %s2091_s0, 32, %s19_s23, [#allocation4]  }
  0x19   :  { %s1797_s29 = scalar_lea.vmem %s40_s25, 768  ;;  %p1802_p11 = scmp.lt.s32.totalorder %s40_s25, %s40_s25 }
  0x1a   :  { %p1798_p10 = scmp.ne.s32.totalorder %s40_s25, %s1797_s29  ;;  %p1803_p12 = scmp.lt.s32.totalorder %s1797_s29, %s1797_s29 }
  0x1c   :  { %p1804_p13 = por %p1803_p12, %p1802_p11 }
  0x1e   :  { %p1805_p0 = pnand %p1804_p13, %p1798_p10 }
  0x20   :  { %1808 = shalt.err (!%p1805_p0)
}
  0x21   :  { %s1840_s1 = smov 64   ;;  %s1841_s30 = smov 4  }
  0x22   :  { %45 = dma.hbm_to_vmem [thread:$0]  %s2093_s2, 768, %s40_s25, [#allocation7], %s1840_s1, %s1840_s1, %s1841_s30  }
  0x23   :  { %1829 = dma.done.wait [#allocation4], 32  }
  0x24   :  { %1830 = vsyncadd [#allocation4], 4294967264 }
  0x25   :  { %1831 = dma.done.wait [#allocation7], 1536  }
  0x26   :  { %1832 = vsyncadd [#allocation7], 4294965760  ;;  %v1842_v0 = vmov 0.0   ;;  %vm1843_vm0 = vmmov 0   ;;  %v1888_v1 = vld [vmem:[#allocation8 + $0x8] sm:$0xff]   ;;  %vm63_vm1 = vcmask 254976  }
  0x27   :  { %1461 = vmatprep.subr.bf16.mxu0 %v1842_v0  ;;  %1465 = vmatprep.mubr.msk.bf16.mxu0 %vm1843_vm0, %v1842_v0  ;;  %v1890_v2 = vld [vmem:[#allocation8] sm:$0xff]   ;;  %v62_v3 = vld [vmem:[#allocation3] sm:$0x3]  ;;  %v1895_v4 = vld [vmem:[#allocation8 + $0x18] sm:$0xff]   ;;  %vm97_vm2 = vcmask 261120  }
  0x28   :  { %1469 = vmatprep.subr.bf16.mxu1 %v1842_v0  ;;  %1473 = vmatprep.mubr.msk.bf16.mxu1 %vm1843_vm0, %v1842_v0  ;;  %64 = vst.msk [vmem:[#allocation2] sm:$0x3] %vm63_vm1, %v62_v3  ;;  %v1898_v5 = vld [vmem:[#allocation8 + $0x10] sm:$0xff]   ;;  %v1904_v7 = vld [vmem:[#allocation8 + $0x28] sm:$0xff]   ;;  %v1910_v9 = vld [vmem:[#allocation8 + $0x20] sm:$0xff]  }
  0x29   :  { %1462 = vmatpush3.bf16.msra.mxu0 %v1888_v1  ;;  %1470 = vmatpush3.bf16.msra.mxu1 %v1895_v4  ;;  %v81_v10 = vld [vmem:[#allocation6] sm:$0x3]  ;;  %v82_v21 = vld [vmem:[#allocation6 + $0x2] sm:$0x3]  ;;  %v1933_v30 = vld [vmem:[%s2094_s3] ss:$0 sm:$0xff] }
  0x2a   :  { %1463 = vmatprep.subr.bf16.mxu0 %v1842_v0  ;;  %1471 = vmatprep.subr.bf16.mxu1 %v1842_v0  ;;  %v83_v35 = vld [vmem:[#allocation6 + $0x4] sm:$0x3]  ;;  %v274_v44 = vld [vmem:[#allocation6 + $0x6] sm:$0x3]  ;;  %v275_v56 = vld [vmem:[#allocation6 + $0x8] sm:$0x3] }
  0x2b   :  { %s1844_s3 = smov [#allocation9]  }
  0x2c   :  { %s1329_s7 = sshll.u32 %s1844_s3, 4  ;;  %s1330_s7 = int_to_ptr.vmem [resolvable:$true] %s1329_s7 }
  0x2d   :  { %1464 = vmatpush3.bf16.msra.mxu0 %v1890_v2  ;;  %1472 = vmatpush3.bf16.msra.mxu1 %v1898_v5  ;;  %s1809_s8 = scalar_lea.vmem %s1330_s7, 256  ;;  %p1814_p2 = scmp.lt.s32.totalorder %s1330_s7, %s1330_s7 }
  0x2e   :  { %1477 = vmatprep.subr.bf16.mxu0 %v1842_v0  ;;  %1485 = vmatprep.subr.bf16.mxu1 %v1842_v0  ;;  %p1810_p1 = scmp.ne.s32.totalorder %s1330_s7, %s1809_s8  ;;  %p1815_p3 = scmp.lt.s32.totalorder %s1809_s8, %s1809_s8 }
  0x2f   :  { %v80_v6 = vld [vmem:[#allocation2] sm:$0x3] }
  0x30   :  { %v84_v8 = vpack.c.bf16 %v80_v6, %v80_v6  ;;  %p1816_p4 = por %p1815_p3, %p1814_p2 }
  0x32   :  { %1466 = vmatmul.mubr.msk.bf16.vlgmr.msra.gmra.mxu0 %vm97_vm2, %v84_v8  ;;  %1474 = vmatmul.mubr.msk.bf16.vlgmr.msra.gmra.mxu1 %vm97_vm2, %v84_v8  ;;  %p1817_p5 = pnand %p1816_p4, %p1810_p1 }
  0x33   :  { %1478 = vmatpush3.bf16.msra.mxu0 %v1904_v7  ;;  %1481 = vmatprep.mubr.msk.bf16.mxu0 %vm1843_vm0, %v1842_v0 }
  0x34   :  { %1479 = vmatprep.subr.bf16.mxu0 %v1842_v0  ;;  %1486 = vmatpush3.bf16.msra.mxu1 %v1888_v1 }
  0x35   :  { %1487 = vmatprep.subr.bf16.mxu1 %v1842_v0  ;;  %1489 = vmatprep.mubr.msk.bf16.mxu1 %vm1843_vm0, %v1842_v0 }
  0x37   :  { %1480 = vmatpush3.bf16.msra.mxu0 %v1910_v9 }
  0x38   :  { %1493 = vmatprep.subr.bf16.mxu0 %v1842_v0  ;;  %1488 = vmatpush3.bf16.msra.mxu1 %v1890_v2 }
  0x39   :  { %1501 = vmatprep.subr.bf16.mxu1 %v1842_v0 }
  0x3a   :  { %1482 = vmatmul.mubr.msk.bf16.vlgmr.msra.gmra.mxu0 %vm97_vm2, %v84_v8 }
  0x3b   :  { %1494 = vmatpush3.bf16.msra.mxu0 %v1895_v4  ;;  %1497 = vmatprep.mubr.msk.bf16.mxu0 %vm1843_vm0, %v1842_v0 }
  0x3c   :  { %1495 = vmatprep.subr.bf16.mxu0 %v1842_v0 }
  0x3f   :  { %1496 = vmatpush3.bf16.msra.mxu0 %v1898_v5 }
  0x40   :  { %1509 = vmatprep.subr.bf16.mxu0 %v1842_v0 }
  0xf2   :  { %v135_v11 = vpop.f32.mrf.mxu0  ;;  %v187_v12 = vpop.f32.mrf.mxu1 }
  0xf3   :  { %v193_v13 = vadd.f32 %v135_v11, %v81_v10  ;;  %v200_v23 = vadd.f32 %v187_v12, %v82_v21  ;;  %v276_v10 = vld [vmem:[#allocation6 + $0xa] sm:$0x3] }
  0xf4   :  { %v1467_v14 = vpop.f32.mrf.mxu0  ;;  %v1475_v15 = vpop.f32.mrf.mxu1 }
  0xf5   :  { %v1348_v16 = vmul.f32 -1.442695, %v193_v13  ;;  %v1349_v26 = vmul.f32 -1.442695, %v200_v23 }
  0xf6   :  { %v138_v17 = vpop.f32.mrf.mxu0  ;;  %v190_v18 = vpop.f32.mrf.mxu1 }
  0xf7   :  { %1669 = vpow2.f32 %v1348_v16 }
  0xf8   :  { %v1468_v19 = vpop.f32.mrf.mxu0  ;;  %v1476_v20 = vpop.f32.mrf.mxu1  ;;  %1671 = vpow2.f32 %v1349_v26 }
  0xf9   :  { %v424_v20 = vld [vmem:[#allocation6 + $0xc] sm:$0x3] }
  0xfa   :  { %v259_v22 = vpop.f32.mrf.mxu0 }
  0xfb   :  { %v260_v32 = vadd.f32 %v1933_v30, %v259_v22 }
  0xfc   :  { %v1483_v24 = vpop.f32.mrf.mxu0 }
  0xfe   :  { %v262_v25 = vpop.f32.mrf.mxu0 }
 0x100   :  { %v1484_v27 = vpop.f32.mrf.mxu0 }
 0x104   :  { %v1670_v28 = vpop.eup %1669 }
 0x105   :  { %v197_v29 = vadd.f32 1.0, %v1670_v28  ;;  %v1672_v31 = vpop.eup %1671 }
 0x106   :  { %v204_v34 = vadd.f32 1.0, %v1672_v31 }
 0x107   :  { %1673 = vrcp.f32 %v197_v29 }
 0x108   :  { %1675 = vrcp.f32 %v204_v34 }
 0x114   :  { %v1674_v33 = vpop.eup %1673 }
 0x115   :  { %v265_v36 = vmul.f32 %v1674_v33, %v260_v32  ;;  %v1676_v38 = vpop.eup %1675  ;;  %v425_v33 = vld [vmem:[#allocation6 + $0xe] sm:$0x3] }
 0x117   :  { %v266_v37 = vadd.f32 %v265_v36, %v83_v35 }
 0x119   :  { %1677 = vtanh.f32 %v266_v37 }
 0x126   :  { %v1678_v39 = vpop.eup %1677 }
 0x127   :  { %v268_v40 = vsub.f32 %v80_v6, %v1678_v39 }
 0x129   :  { %v269_v41 = vmul.f32 %v1676_v38, %v268_v40 }
 0x12b   :  { %v270_v42 = vadd.f32 %v1678_v39, %v269_v41 }
 0x12d   :  { %272 = vst.msk [vmem:[#allocation9] sm:$0x3] %vm63_vm1, %v270_v42  ;;  %v277_v43 = vpack.c.bf16 %v270_v42, %v270_v42 }
 0x12f   :  { %1490 = vmatmul.mubr.msk.bf16.vlgmr.msra.gmra.mxu1 %vm97_vm2, %v277_v43  ;;  %1498 = vmatmul.mubr.msk.bf16.vlgmr.msra.gmra.mxu0 %vm97_vm2, %v277_v43 }
 0x130   :  { %1502 = vmatpush3.bf16.msra.mxu1 %v1904_v7  ;;  %1505 = vmatprep.mubr.msk.bf16.mxu1 %vm1843_vm0, %v1842_v0 }
 0x131   :  { %1503 = vmatprep.subr.bf16.mxu1 %v1842_v0  ;;  %1510 = vmatpush3.bf16.msra.mxu0 %v1888_v1 }
 0x132   :  { %1511 = vmatprep.subr.bf16.mxu0 %v1842_v0  ;;  %1513 = vmatprep.mubr.msk.bf16.mxu0 %vm1843_vm0, %v1842_v0 }
 0x134   :  { %1504 = vmatpush3.bf16.msra.mxu1 %v1910_v9 }
 0x135   :  { %1517 = vmatprep.subr.bf16.mxu1 %v1842_v0  ;;  %1512 = vmatpush3.bf16.msra.mxu0 %v1890_v2 }
 0x136   :  { %1525 = vmatprep.subr.bf16.mxu0 %v1842_v0 }
 0x137   :  { %1506 = vmatmul.mubr.msk.bf16.vlgmr.msra.gmra.mxu1 %vm97_vm2, %v277_v43 }
 0x138   :  { %1518 = vmatpush3.bf16.msra.mxu1 %v1895_v4  ;;  %1521 = vmatprep.mubr.msk.bf16.mxu1 %vm1843_vm0, %v1842_v0 }
 0x139   :  { %1519 = vmatprep.subr.bf16.mxu1 %v1842_v0 }
 0x13c   :  { %1520 = vmatpush3.bf16.msra.mxu1 %v1898_v5 }
 0x13d   :  { %1533 = vmatprep.subr.bf16.mxu1 %v1842_v0 }
 0x1ef   :  { %v315_v45 = vpop.f32.mrf.mxu1  ;;  %v355_v46 = vpop.f32.mrf.mxu0 }
 0x1f0   :  { %v361_v47 = vadd.f32 %v315_v45, %v274_v44  ;;  %v368_v58 = vadd.f32 %v355_v46, %v275_v56  ;;  %v426_v44 = vld [vmem:[#allocation6 + $0x10] sm:$0x3] }
 0x1f1   :  { %v1491_v48 = vpop.f32.mrf.mxu1  ;;  %v1499_v49 = vpop.f32.mrf.mxu0 }
 0x1f2   :  { %v1356_v50 = vmul.f32 -1.442695, %v361_v47  ;;  %v1357_v61 = vmul.f32 -1.442695, %v368_v58 }
 0x1f3   :  { %v318_v51 = vpop.f32.mrf.mxu1  ;;  %v358_v52 = vpop.f32.mrf.mxu0 }
 0x1f4   :  { %1679 = vpow2.f32 %v1356_v50 }
 0x1f5   :  { %v1492_v53 = vpop.f32.mrf.mxu1  ;;  %v1500_v54 = vpop.f32.mrf.mxu0  ;;  %1681 = vpow2.f32 %v1357_v61 }
 0x1f6   :  { %v574_v54 = vld [vmem:[#allocation6 + $0x12] sm:$0x3] }
 0x1f7   :  { %v409_v55 = vpop.f32.mrf.mxu1 }
 0x1f8   :  { %v410_v6 = vadd.f32 %v1933_v30, %v409_v55 }
 0x1f9   :  { %v1507_v57 = vpop.f32.mrf.mxu1 }
 0x1fb   :  { %v412_v59 = vpop.f32.mrf.mxu1 }
 0x1fd   :  { %v1508_v60 = vpop.f32.mrf.mxu1 }
 0x201   :  { %v1680_v62 = vpop.eup %1679 }
 0x202   :  { %v365_v63 = vadd.f32 1.0, %v1680_v62  ;;  %v1682_v3 = vpop.eup %1681 }
 0x203   :  { %v372_v12 = vadd.f32 1.0, %v1682_v3 }
 0x204   :  { %1683 = vrcp.f32 %v365_v63 }
 0x211   :  { %v1684_v8 = vpop.eup %1683 }
 0x212   :  { %v415_v11 = vmul.f32 %v1684_v8, %v410_v6  ;;  %v575_v8 = vld [vmem:[#allocation6 + $0x14] sm:$0x3] }
 0x214   :  { %v416_v13 = vadd.f32 %v415_v11, %v276_v10 }
 0x216   :  { %1685 = vtanh.f32 %v416_v13 }
 0x217   :  { %1687 = vrcp.f32 %v372_v12 }
 0x223   :  { %v1686_v14 = vpop.eup %1685 }
 0x224   :  { %v418_v15 = vsub.f32 %v270_v42, %v1686_v14  ;;  %v1688_v16 = vpop.eup %1687 }
 0x226   :  { %v419_v17 = vmul.f32 %v1688_v16, %v418_v15 }
 0x228   :  { %v420_v18 = vadd.f32 %v1686_v14, %v419_v17 }
 0x22a   :  { %422 = vst.msk [vmem:[#allocation9 + $0x2] sm:$0x3] %vm63_vm1, %v420_v18  ;;  %v427_v19 = vpack.c.bf16 %v420_v18, %v420_v18 }
 0x22c   :  { %1514 = vmatmul.mubr.msk.bf16.vlgmr.msra.gmra.mxu0 %vm97_vm2, %v427_v19  ;;  %1522 = vmatmul.mubr.msk.bf16.vlgmr.msra.gmra.mxu1 %vm97_vm2, %v427_v19 }
 0x22d   :  { %1526 = vmatpush3.bf16.msra.mxu0 %v1904_v7  ;;  %1529 = vmatprep.mubr.msk.bf16.mxu0 %vm1843_vm0, %v1842_v0 }
 0x22e   :  { %1527 = vmatprep.subr.bf16.mxu0 %v1842_v0  ;;  %1534 = vmatpush3.bf16.msra.mxu1 %v1888_v1 }
 0x22f   :  { %1535 = vmatprep.subr.bf16.mxu1 %v1842_v0  ;;  %1537 = vmatprep.mubr.msk.bf16.mxu1 %vm1843_vm0, %v1842_v0 }
 0x231   :  { %1528 = vmatpush3.bf16.msra.mxu0 %v1910_v9 }
 0x232   :  { %1541 = vmatprep.subr.bf16.mxu0 %v1842_v0  ;;  %1536 = vmatpush3.bf16.msra.mxu1 %v1890_v2 }
 0x233   :  { %1549 = vmatprep.subr.bf16.mxu1 %v1842_v0 }
 0x234   :  { %1530 = vmatmul.mubr.msk.bf16.vlgmr.msra.gmra.mxu0 %vm97_vm2, %v427_v19 }
 0x235   :  { %1542 = vmatpush3.bf16.msra.mxu0 %v1895_v4  ;;  %1545 = vmatprep.mubr.msk.bf16.mxu0 %vm1843_vm0, %v1842_v0 }
 0x236   :  { %1543 = vmatprep.subr.bf16.mxu0 %v1842_v0 }
 0x239   :  { %1544 = vmatpush3.bf16.msra.mxu0 %v1898_v5 }
 0x23a   :  { %1557 = vmatprep.subr.bf16.mxu0 %v1842_v0 }
 0x2ec   :  { %v465_v21 = vpop.f32.mrf.mxu0  ;;  %v505_v22 = vpop.f32.mrf.mxu1 }
 0x2ed   :  { %v511_v23 = vadd.f32 %v465_v21, %v424_v20  ;;  %v518_v35 = vadd.f32 %v505_v22, %v425_v33  ;;  %v576_v20 = vld [vmem:[#allocation6 + $0x16] sm:$0x3] }
 0x2ee   :  { %v1515_v24 = vpop.f32.mrf.mxu0  ;;  %v1523_v25 = vpop.f32.mrf.mxu1 }
 0x2ef   :  { %v1361_v26 = vmul.f32 -1.442695, %v511_v23  ;;  %v1362_v38 = vmul.f32 -1.442695, %v518_v35 }
 0x2f0   :  { %v468_v27 = vpop.f32.mrf.mxu0  ;;  %v508_v28 = vpop.f32.mrf.mxu1 }
 0x2f1   :  { %1689 = vpow2.f32 %v1361_v26 }
 0x2f2   :  { %v1516_v29 = vpop.f32.mrf.mxu0  ;;  %v1524_v31 = vpop.f32.mrf.mxu1  ;;  %1691 = vpow2.f32 %v1362_v38 }
 0x2f3   :  { %v724_v31 = vld [vmem:[#allocation6 + $0x18] sm:$0x3] }
 0x2f4   :  { %v559_v32 = vpop.f32.mrf.mxu0 }
 0x2f5   :  { %v560_v42 = vadd.f32 %v1933_v30, %v559_v32 }
 0x2f6   :  { %v1531_v34 = vpop.f32.mrf.mxu0 }
 0x2f8   :  { %v562_v36 = vpop.f32.mrf.mxu0 }
 0x2fa   :  { %v1532_v37 = vpop.f32.mrf.mxu0 }
 0x2fe   :  { %v1690_v39 = vpop.eup %1689 }
 0x2ff   :  { %v515_v40 = vadd.f32 1.0, %v1690_v39  ;;  %v1692_v41 = vpop.eup %1691 }
 0x300   :  { %v522_v46 = vadd.f32 1.0, %v1692_v41 }
 0x301   :  { %1693 = vrcp.f32 %v515_v40 }
 0x30e   :  { %v1694_v43 = vpop.eup %1693 }
 0x30f   :  { %v565_v45 = vmul.f32 %v1694_v43, %v560_v42  ;;  %v725_v43 = vld [vmem:[#allocation6 + $0x1a] sm:$0x3] }
 0x311   :  { %v566_v47 = vadd.f32 %v565_v45, %v426_v44 }
 0x313   :  { %1695 = vtanh.f32 %v566_v47 }
 0x314   :  { %1697 = vrcp.f32 %v522_v46 }
 0x320   :  { %v1696_v48 = vpop.eup %1695 }
 0x321   :  { %v568_v49 = vsub.f32 %v420_v18, %v1696_v48  ;;  %v1698_v50 = vpop.eup %1697 }
 0x323   :  { %v569_v51 = vmul.f32 %v1698_v50, %v568_v49 }
 0x325   :  { %v570_v52 = vadd.f32 %v1696_v48, %v569_v51 }
 0x327   :  { %572 = vst.msk [vmem:[#allocation9 + $0x4] sm:$0x3] %vm63_vm1, %v570_v52  ;;  %v577_v53 = vpack.c.bf16 %v570_v52, %v570_v52 }
 0x329   :  { %1538 = vmatmul.mubr.msk.bf16.vlgmr.msra.gmra.mxu1 %vm97_vm2, %v577_v53  ;;  %1546 = vmatmul.mubr.msk.bf16.vlgmr.msra.gmra.mxu0 %vm97_vm2, %v577_v53 }
 0x32a   :  { %1550 = vmatpush3.bf16.msra.mxu1 %v1904_v7  ;;  %1553 = vmatprep.mubr.msk.bf16.mxu1 %vm1843_vm0, %v1842_v0 }
 0x32b   :  { %1551 = vmatprep.subr.bf16.mxu1 %v1842_v0  ;;  %1558 = vmatpush3.bf16.msra.mxu0 %v1888_v1 }
 0x32c   :  { %1559 = vmatprep.subr.bf16.mxu0 %v1842_v0  ;;  %1561 = vmatprep.mubr.msk.bf16.mxu0 %vm1843_vm0, %v1842_v0 }
 0x32e   :  { %1552 = vmatpush3.bf16.msra.mxu1 %v1910_v9 }
 0x32f   :  { %1565 = vmatprep.subr.bf16.mxu1 %v1842_v0  ;;  %1560 = vmatpush3.bf16.msra.mxu0 %v1890_v2 }
 0x330   :  { %1573 = vmatprep.subr.bf16.mxu0 %v1842_v0 }
 0x331   :  { %1554 = vmatmul.mubr.msk.bf16.vlgmr.msra.gmra.mxu1 %vm97_vm2, %v577_v53 }
 0x332   :  { %1566 = vmatpush3.bf16.msra.mxu1 %v1895_v4  ;;  %1569 = vmatprep.mubr.msk.bf16.mxu1 %vm1843_vm0, %v1842_v0 }
 0x333   :  { %1567 = vmatprep.subr.bf16.mxu1 %v1842_v0 }
 0x336   :  { %1568 = vmatpush3.bf16.msra.mxu1 %v1898_v5 }
 0x337   :  { %1581 = vmatprep.subr.bf16.mxu1 %v1842_v0 }
 0x3e9   :  { %v615_v55 = vpop.f32.mrf.mxu1  ;;  %v655_v56 = vpop.f32.mrf.mxu0 }
 0x3ea   :  { %v661_v57 = vadd.f32 %v615_v55, %v574_v54  ;;  %v668_v11 = vadd.f32 %v655_v56, %v575_v8  ;;  %v726_v54 = vld [vmem:[#allocation6 + $0x1c] sm:$0x3] }
 0x3eb   :  { %v1539_v58 = vpop.f32.mrf.mxu1  ;;  %v1547_v59 = vpop.f32.mrf.mxu0 }
 0x3ec   :  { %v1366_v60 = vmul.f32 -1.442695, %v661_v57  ;;  %v1367_v14 = vmul.f32 -1.442695, %v668_v11 }
 0x3ed   :  { %v618_v61 = vpop.f32.mrf.mxu1  ;;  %v658_v62 = vpop.f32.mrf.mxu0 }
 0x3ee   :  { %1699 = vpow2.f32 %v1366_v60 }
 0x3ef   :  { %v1540_v63 = vpop.f32.mrf.mxu1  ;;  %v1548_v3 = vpop.f32.mrf.mxu0  ;;  %1701 = vpow2.f32 %v1367_v14 }
 0x3f0   :  { %v874_v3 = vld [vmem:[#allocation6 + $0x1e] sm:$0x3] }
 0x3f1   :  { %v709_v6 = vpop.f32.mrf.mxu1 }
 0x3f2   :  { %v710_v18 = vadd.f32 %v1933_v30, %v709_v6 }
 0x3f3   :  { %v1555_v10 = vpop.f32.mrf.mxu1 }
 0x3f5   :  { %v712_v12 = vpop.f32.mrf.mxu1 }
 0x3f7   :  { %v1556_v13 = vpop.f32.mrf.mxu1 }
 0x3fb   :  { %v1700_v15 = vpop.eup %1699 }
 0x3fc   :  { %v665_v16 = vadd.f32 1.0, %v1700_v15  ;;  %v1702_v17 = vpop.eup %1701 }
 0x3fd   :  { %v672_v22 = vadd.f32 1.0, %v1702_v17 }
 0x3fe   :  { %1703 = vrcp.f32 %v665_v16 }
 0x40b   :  { %v1704_v19 = vpop.eup %1703 }
 0x40c   :  { %v715_v21 = vmul.f32 %v1704_v19, %v710_v18  ;;  %v875_v19 = vld [vmem:[#allocation6 + $0x20] sm:$0x3] }
 0x40e   :  { %v716_v23 = vadd.f32 %v715_v21, %v576_v20 }
 0x410   :  { %1705 = vtanh.f32 %v716_v23 }
 0x411   :  { %1707 = vrcp.f32 %v672_v22 }
 0x41d   :  { %v1706_v24 = vpop.eup %1705 }
 0x41e   :  { %v718_v25 = vsub.f32 %v570_v52, %v1706_v24  ;;  %v1708_v26 = vpop.eup %1707 }
 0x420   :  { %v719_v27 = vmul.f32 %v1708_v26, %v718_v25 }
 0x422   :  { %v720_v28 = vadd.f32 %v1706_v24, %v719_v27 }
 0x424   :  { %722 = vst.msk [vmem:[#allocation9 + $0x6] sm:$0x3] %vm63_vm1, %v720_v28  ;;  %v727_v29 = vpack.c.bf16 %v720_v28, %v720_v28 }
 0x426   :  { %1562 = vmatmul.mubr.msk.bf16.vlgmr.msra.gmra.mxu0 %vm97_vm2, %v727_v29  ;;  %1570 = vmatmul.mubr.msk.bf16.vlgmr.msra.gmra.mxu1 %vm97_vm2, %v727_v29 }
 0x427   :  { %1574 = vmatpush3.bf16.msra.mxu0 %v1904_v7  ;;  %1577 = vmatprep.mubr.msk.bf16.mxu0 %vm1843_vm0, %v1842_v0 }
 0x428   :  { %1575 = vmatprep.subr.bf16.mxu0 %v1842_v0  ;;  %1582 = vmatpush3.bf16.msra.mxu1 %v1888_v1 }
 0x429   :  { %1583 = vmatprep.subr.bf16.mxu1 %v1842_v0  ;;  %1585 = vmatprep.mubr.msk.bf16.mxu1 %vm1843_vm0, %v1842_v0 }
 0x42b   :  { %1576 = vmatpush3.bf16.msra.mxu0 %v1910_v9 }
 0x42c   :  { %1589 = vmatprep.subr.bf16.mxu0 %v1842_v0  ;;  %1584 = vmatpush3.bf16.msra.mxu1 %v1890_v2 }
 0x42d   :  { %1597 = vmatprep.subr.bf16.mxu1 %v1842_v0 }
 0x42e   :  { %1578 = vmatmul.mubr.msk.bf16.vlgmr.msra.gmra.mxu0 %vm97_vm2, %v727_v29 }
 0x42f   :  { %1590 = vmatpush3.bf16.msra.mxu0 %v1895_v4  ;;  %1593 = vmatprep.mubr.msk.bf16.mxu0 %vm1843_vm0, %v1842_v0 }
 0x430   :  { %1591 = vmatprep.subr.bf16.mxu0 %v1842_v0 }
 0x433   :  { %1592 = vmatpush3.bf16.msra.mxu0 %v1898_v5 }
 0x434   :  { %1605 = vmatprep.subr.bf16.mxu0 %v1842_v0 }
 0x4e6   :  { %v765_v32 = vpop.f32.mrf.mxu0  ;;  %v805_v33 = vpop.f32.mrf.mxu1 }
 0x4e7   :  { %v811_v34 = vadd.f32 %v765_v32, %v724_v31  ;;  %v818_v45 = vadd.f32 %v805_v33, %v725_v43  ;;  %v876_v31 = vld [vmem:[#allocation6 + $0x22] sm:$0x3] }
 0x4e8   :  { %v1563_v35 = vpop.f32.mrf.mxu0  ;;  %v1571_v36 = vpop.f32.mrf.mxu1 }
 0x4e9   :  { %v1371_v37 = vmul.f32 -1.442695, %v811_v34  ;;  %v1372_v48 = vmul.f32 -1.442695, %v818_v45 }
 0x4ea   :  { %v768_v38 = vpop.f32.mrf.mxu0  ;;  %v808_v39 = vpop.f32.mrf.mxu1 }
 0x4eb   :  { %1709 = vpow2.f32 %v1371_v37 }
 0x4ec   :  { %v1564_v40 = vpop.f32.mrf.mxu0  ;;  %v1572_v41 = vpop.f32.mrf.mxu1  ;;  %1711 = vpow2.f32 %v1372_v48 }
 0x4ee   :  { %v859_v42 = vpop.f32.mrf.mxu0 }
 0x4ef   :  { %v860_v52 = vadd.f32 %v1933_v30, %v859_v42 }
 0x4f0   :  { %v1579_v44 = vpop.f32.mrf.mxu0 }
 0x4f2   :  { %v862_v46 = vpop.f32.mrf.mxu0 }
 0x4f4   :  { %v1580_v47 = vpop.f32.mrf.mxu0 }
 0x4f8   :  { %v1710_v49 = vpop.eup %1709 }
 0x4f9   :  { %v815_v50 = vadd.f32 1.0, %v1710_v49  ;;  %v1712_v51 = vpop.eup %1711 }
 0x4fa   :  { %v822_v56 = vadd.f32 1.0, %v1712_v51 }
 0x4fb   :  { %1713 = vrcp.f32 %v815_v50  ;;  %v1025_v50 = vld [vmem:[#allocation6 + $0x26] sm:$0x3] }
 0x508   :  { %v1714_v53 = vpop.eup %1713 }
 0x509   :  { %v865_v55 = vmul.f32 %v1714_v53, %v860_v52 }
 0x50b   :  { %v866_v57 = vadd.f32 %v865_v55, %v726_v54 }
 0x50d   :  { %1715 = vtanh.f32 %v866_v57 }
 0x50e   :  { %1717 = vrcp.f32 %v822_v56 }
 0x51a   :  { %v1716_v58 = vpop.eup %1715 }
 0x51b   :  { %v868_v59 = vsub.f32 %v720_v28, %v1716_v58  ;;  %v1718_v60 = vpop.eup %1717 }
 0x51d   :  { %v869_v61 = vmul.f32 %v1718_v60, %v868_v59  ;;  %v1026_v60 = vld [vmem:[#allocation6 + $0x28] sm:$0x3] }
 0x51f   :  { %v870_v62 = vadd.f32 %v1716_v58, %v869_v61 }
 0x521   :  { %872 = vst.msk [vmem:[#allocation9 + $0x8] sm:$0x3] %vm63_vm1, %v870_v62  ;;  %v877_v63 = vpack.c.bf16 %v870_v62, %v870_v62 }
 0x523   :  { %1586 = vmatmul.mubr.msk.bf16.vlgmr.msra.gmra.mxu1 %vm97_vm2, %v877_v63  ;;  %1594 = vmatmul.mubr.msk.bf16.vlgmr.msra.gmra.mxu0 %vm97_vm2, %v877_v63 }
 0x524   :  { %1598 = vmatpush3.bf16.msra.mxu1 %v1904_v7  ;;  %1601 = vmatprep.mubr.msk.bf16.mxu1 %vm1843_vm0, %v1842_v0 }
 0x525   :  { %1599 = vmatprep.subr.bf16.mxu1 %v1842_v0  ;;  %1606 = vmatpush3.bf16.msra.mxu0 %v1888_v1 }
 0x526   :  { %1607 = vmatprep.subr.bf16.mxu0 %v1842_v0  ;;  %1609 = vmatprep.mubr.msk.bf16.mxu0 %vm1843_vm0, %v1842_v0 }
 0x528   :  { %1600 = vmatpush3.bf16.msra.mxu1 %v1910_v9 }
 0x529   :  { %1613 = vmatprep.subr.bf16.mxu1 %v1842_v0  ;;  %1608 = vmatpush3.bf16.msra.mxu0 %v1890_v2 }
 0x52a   :  { %1621 = vmatprep.subr.bf16.mxu0 %v1842_v0 }
 0x52b   :  { %1602 = vmatmul.mubr.msk.bf16.vlgmr.msra.gmra.mxu1 %vm97_vm2, %v877_v63 }
 0x52c   :  { %1614 = vmatpush3.bf16.msra.mxu1 %v1895_v4  ;;  %1617 = vmatprep.mubr.msk.bf16.mxu1 %vm1843_vm0, %v1842_v0 }
 0x52d   :  { %1615 = vmatprep.subr.bf16.mxu1 %v1842_v0 }
 0x530   :  { %1616 = vmatpush3.bf16.msra.mxu1 %v1898_v5 }
 0x531   :  { %1629 = vmatprep.subr.bf16.mxu1 %v1842_v0 }
 0x5e3   :  { %v915_v6 = vpop.f32.mrf.mxu1  ;;  %v955_v8 = vpop.f32.mrf.mxu0 }
 0x5e4   :  { %v961_v10 = vadd.f32 %v915_v6, %v874_v3  ;;  %v968_v21 = vadd.f32 %v955_v8, %v875_v19 }
 0x5e5   :  { %v1587_v11 = vpop.f32.mrf.mxu1  ;;  %v1595_v12 = vpop.f32.mrf.mxu0 }
 0x5e6   :  { %v1376_v13 = vmul.f32 -1.442695, %v961_v10  ;;  %v1377_v24 = vmul.f32 -1.442695, %v968_v21 }
 0x5e7   :  { %v918_v14 = vpop.f32.mrf.mxu1  ;;  %v958_v15 = vpop.f32.mrf.mxu0 }
 0x5e8   :  { %1719 = vpow2.f32 %v1376_v13  ;;  %v1174_v13 = vld [vmem:[#allocation6 + $0x2a] sm:$0x3] }
 0x5e9   :  { %v1588_v16 = vpop.f32.mrf.mxu1  ;;  %v1596_v17 = vpop.f32.mrf.mxu0  ;;  %1721 = vpow2.f32 %v1377_v24  ;;  %v1175_v24 = vld [vmem:[#allocation6 + $0x2c] sm:$0x3] }
 0x5eb   :  { %v1009_v18 = vpop.f32.mrf.mxu1 }
 0x5ec   :  { %v1010_v28 = vadd.f32 %v1933_v30, %v1009_v18 }
 0x5ed   :  { %v1603_v20 = vpop.f32.mrf.mxu1 }
 0x5ef   :  { %v1012_v22 = vpop.f32.mrf.mxu1 }
 0x5f1   :  { %v1604_v23 = vpop.f32.mrf.mxu1 }
 0x5f5   :  { %v1720_v25 = vpop.eup %1719 }
 0x5f6   :  { %v965_v26 = vadd.f32 1.0, %v1720_v25  ;;  %v1722_v27 = vpop.eup %1721 }
 0x5f7   :  { %v972_v33 = vadd.f32 1.0, %v1722_v27 }
 0x5f8   :  { %1723 = vrcp.f32 %v965_v26 }
 0x605   :  { %v1724_v29 = vpop.eup %1723 }
 0x606   :  { %v1015_v32 = vmul.f32 %v1724_v29, %v1010_v28 }
 0x608   :  { %v1016_v34 = vadd.f32 %v1015_v32, %v876_v31 }
 0x60a   :  { %1725 = vtanh.f32 %v1016_v34  ;;  %v1176_v34 = vld [vmem:[#allocation6 + $0x2e] sm:$0x3] }
 0x60b   :  { %1727 = vrcp.f32 %v972_v33 }
 0x617   :  { %v1726_v35 = vpop.eup %1725 }
 0x618   :  { %v1018_v36 = vsub.f32 %v870_v62, %v1726_v35  ;;  %v1728_v37 = vpop.eup %1727 }
 0x61a   :  { %v1019_v38 = vmul.f32 %v1728_v37, %v1018_v36 }
 0x61c   :  { %v1020_v39 = vadd.f32 %v1726_v35, %v1019_v38 }
 0x61e   :  { %1022 = vst.msk [vmem:[#allocation9 + $0xa] sm:$0x3] %vm63_vm1, %v1020_v39  ;;  %v1027_v40 = vpack.c.bf16 %v1020_v39, %v1020_v39 }
 0x620   :  { %1610 = vmatmul.mubr.msk.bf16.vlgmr.msra.gmra.mxu0 %vm97_vm2, %v1027_v40  ;;  %1618 = vmatmul.mubr.msk.bf16.vlgmr.msra.gmra.mxu1 %vm97_vm2, %v1027_v40 }
 0x621   :  { %1622 = vmatpush3.bf16.msra.mxu0 %v1904_v7  ;;  %1625 = vmatprep.mubr.msk.bf16.mxu0 %vm1843_vm0, %v1842_v0 }
 0x622   :  { %1623 = vmatprep.subr.bf16.mxu0 %v1842_v0  ;;  %1630 = vmatpush3.bf16.msra.mxu1 %v1888_v1  ;;  %v1024_v1 = vld [vmem:[#allocation6 + $0x24] sm:$0x3] }
 0x623   :  { %1631 = vmatprep.subr.bf16.mxu1 %v1842_v0  ;;  %1633 = vmatprep.mubr.msk.bf16.mxu1 %vm1843_vm0, %v1842_v0 }
 0x625   :  { %1624 = vmatpush3.bf16.msra.mxu0 %v1910_v9 }
 0x626   :  { %1637 = vmatprep.subr.bf16.mxu0 %v1842_v0  ;;  %1632 = vmatpush3.bf16.msra.mxu1 %v1890_v2 }
 0x627   :  { %1645 = vmatprep.subr.bf16.mxu1 %v1842_v0 }
 0x628   :  { %1626 = vmatmul.mubr.msk.bf16.vlgmr.msra.gmra.mxu0 %vm97_vm2, %v1027_v40 }
 0x629   :  { %1638 = vmatpush3.bf16.msra.mxu0 %v1895_v4  ;;  %1641 = vmatprep.mubr.msk.bf16.mxu0 %vm1843_vm0, %v1842_v0 }
 0x62a   :  { %1639 = vmatprep.subr.bf16.mxu0 %v1842_v0 }
 0x62d   :  { %1640 = vmatpush3.bf16.msra.mxu0 %v1898_v5 }
 0x6e0   :  { %v1065_v41 = vpop.f32.mrf.mxu0  ;;  %v1105_v42 = vpop.f32.mrf.mxu1 }
 0x6e1   :  { %v1111_v43 = vadd.f32 %v1065_v41, %v1024_v1  ;;  %v1118_v52 = vadd.f32 %v1105_v42, %v1025_v50 }
 0x6e2   :  { %v1611_v44 = vpop.f32.mrf.mxu0  ;;  %v1619_v45 = vpop.f32.mrf.mxu1 }
 0x6e3   :  { %v1381_v2 = vmul.f32 -1.442695, %v1111_v43  ;;  %v1382_v55 = vmul.f32 -1.442695, %v1118_v52 }
 0x6e4   :  { %v1068_v46 = vpop.f32.mrf.mxu0  ;;  %v1108_v47 = vpop.f32.mrf.mxu1 }
 0x6e5   :  { %1729 = vpow2.f32 %v1381_v2 }
 0x6e6   :  { %v1612_v48 = vpop.f32.mrf.mxu0  ;;  %v1620_v49 = vpop.f32.mrf.mxu1  ;;  %1731 = vpow2.f32 %v1382_v55 }
 0x6e8   :  { %v1159_v4 = vpop.f32.mrf.mxu0 }
 0x6e9   :  { %v1160_v58 = vadd.f32 %v1933_v30, %v1159_v4 }
 0x6ea   :  { %v1627_v51 = vpop.f32.mrf.mxu0 }
 0x6ec   :  { %v1162_v53 = vpop.f32.mrf.mxu0 }
 0x6ee   :  { %v1628_v54 = vpop.f32.mrf.mxu0 }
 0x6f2   :  { %v1730_v5 = vpop.eup %1729 }
 0x6f3   :  { %v1115_v56 = vadd.f32 1.0, %v1730_v5  ;;  %v1732_v57 = vpop.eup %1731 }
 0x6f4   :  { %v1122_v62 = vadd.f32 1.0, %v1732_v57 }
 0x6f5   :  { %1733 = vrcp.f32 %v1115_v56 }
 0x702   :  { %v1734_v59 = vpop.eup %1733 }
 0x703   :  { %v1165_v61 = vmul.f32 %v1734_v59, %v1160_v58 }
 0x705   :  { %v1166_v63 = vadd.f32 %v1165_v61, %v1026_v60 }
 0x707   :  { %1735 = vtanh.f32 %v1166_v63 }
 0x708   :  { %1737 = vrcp.f32 %v1122_v62 }
 0x714   :  { %v1736_v3 = vpop.eup %1735 }
 0x715   :  { %v1168_v6 = vsub.f32 %v1020_v39, %v1736_v3  ;;  %v1738_v8 = vpop.eup %1737 }
 0x717   :  { %v1169_v10 = vmul.f32 %v1738_v8, %v1168_v6 }
 0x719   :  { %v1170_v11 = vadd.f32 %v1736_v3, %v1169_v10 }
 0x71b   :  { %1172 = vst.msk [vmem:[#allocation9 + $0xc] sm:$0x3] %vm63_vm1, %v1170_v11  ;;  %v1177_v12 = vpack.c.bf16 %v1170_v11, %v1170_v11 }
 0x71d   :  { %1634 = vmatmul.mubr.msk.bf16.vlgmr.msra.gmra.mxu1 %vm97_vm2, %v1177_v12  ;;  %1642 = vmatmul.mubr.msk.bf16.vlgmr.msra.gmra.mxu0 %vm97_vm2, %v1177_v12 }
 0x71e   :  { %1646 = vmatpush3.bf16.msra.mxu1 %v1904_v7  ;;  %1649 = vmatprep.mubr.msk.bf16.mxu1 %vm1843_vm0, %v1842_v0 }
 0x71f   :  { %1647 = vmatprep.subr.bf16.mxu1 %v1842_v0 }
 0x722   :  { %1648 = vmatpush3.bf16.msra.mxu1 %v1910_v9 }
 0x725   :  { %1650 = vmatmul.mubr.msk.bf16.vlgmr.msra.gmra.mxu1 %vm97_vm2, %v1177_v12 }
 0x7dd   :  { %v1215_v14 = vpop.f32.mrf.mxu1  ;;  %v1255_v15 = vpop.f32.mrf.mxu0 }
 0x7de   :  { %v1261_v16 = vadd.f32 %v1215_v14, %v1174_v13  ;;  %v1268_v0 = vadd.f32 %v1255_v15, %v1175_v24 }
 0x7df   :  { %v1635_v17 = vpop.f32.mrf.mxu1  ;;  %v1643_v18 = vpop.f32.mrf.mxu0 }
 0x7e0   :  { %v1386_v19 = vmul.f32 -1.442695, %v1261_v16  ;;  %v1387_v27 = vmul.f32 -1.442695, %v1268_v0 }
 0x7e1   :  { %v1218_v20 = vpop.f32.mrf.mxu1  ;;  %v1258_v21 = vpop.f32.mrf.mxu0 }
 0x7e2   :  { %1739 = vpow2.f32 %v1386_v19 }
 0x7e3   :  { %v1636_v7 = vpop.f32.mrf.mxu1  ;;  %v1644_v22 = vpop.f32.mrf.mxu0  ;;  %1741 = vpow2.f32 %v1387_v27 }
 0x7e5   :  { %v1309_v23 = vpop.f32.mrf.mxu1 }
 0x7e6   :  { %v1310_v32 = vadd.f32 %v1933_v30, %v1309_v23 }
 0x7e7   :  { %v1651_v25 = vpop.f32.mrf.mxu1 }
 0x7e9   :  { %v1312_v26 = vpop.f32.mrf.mxu1 }
 0x7eb   :  { %v1652_v9 = vpop.f32.mrf.mxu1 }
 0x7ef   :  { %v1740_v28 = vpop.eup %1739 }
 0x7f0   :  { %v1265_v29 = vadd.f32 1.0, %v1740_v28  ;;  %v1742_v31 = vpop.eup %1741 }
 0x7f1   :  { %v1272_v36 = vadd.f32 1.0, %v1742_v31 }
 0x7f2   :  { %1743 = vrcp.f32 %v1265_v29 }
 0x7ff   :  { %v1744_v33 = vpop.eup %1743 }
 0x800   :  { %v1315_v35 = vmul.f32 %v1744_v33, %v1310_v32 }
 0x802   :  { %v1316_v37 = vadd.f32 %v1315_v35, %v1176_v34 }
 0x804   :  { %1745 = vtanh.f32 %v1316_v37 }
 0x805   :  { %1747 = vrcp.f32 %v1272_v36 }
 0x811   :  { %v1746_v38 = vpop.eup %1745 }
 0x812   :  { %v1318_v39 = vsub.f32 %v1170_v11, %v1746_v38  ;;  %v1748_v40 = vpop.eup %1747 }
 0x814   :  { %v1319_v1 = vmul.f32 %v1748_v40, %v1318_v39 }
 0x816   :  { %v1320_v41 = vadd.f32 %v1746_v38, %v1319_v1 }
 0x818   :  { %1322 = vst.msk [vmem:[#allocation9 + $0xe] sm:$0x3] %vm63_vm1, %v1320_v41  ;;  %1323 = vst.msk [vmem:[#allocation2] sm:$0x3] %vm63_vm1, %v1320_v41 }
 0x819   :  { %1820 = shalt.err (!%p1817_p5)
}
 0x81a   :  { %1335 = dma.vmem_to_hbm [thread:$0]  %s1330_s7, 256, %s2095_s4, [#allocation5], %s1836_s18, %s1836_s18, %s1837_s19  }
 0x81b   :  { %1833 = dma.done.wait [#allocation5], 256  }
 0x81c   :  { %1834 = vsyncadd [#allocation5], 4294967040 }
 0x81d   :  { %1339 = vsyncpa [#allocation4], 1 }
 0x81e   :  { %1340 = vsyncpa [#allocation7], 1 }
 0x81f   :  { %1341 = vsyncpa [#allocation5], 1 }

</bundles_post_ra>
